<compile_context>
chip_gen: v7x
topology: tpu7x:2x2x1
jax: 0.10.0
libtpu: 0.0.40
codegen_flags: <defaults>
</compile_context>

<pallas_src>
import functools
import math

import jax
import jax.numpy as jnp
from jax import lax
from jax.experimental import pallas as pl
from jax.experimental.pallas import tpu as pltpu


def _attn_kernel(x_ref, wqkv_ref, bqkv_ref, wo_ref, bo_ref, out_ref, *,
                 num_heads, fused_out_proj, low_precision_exp):
    dot_dtype = x_ref.dtype            # MXU input dtype (f32 or bf16)
    x = x_ref[0]                       # (N, E)
    n, e = x.shape
    d = e // num_heads

    # Fused Q/K/V projection; 1/tau is baked into the Q columns of wqkv/bqkv
    # by prepare_attention_params().  Bias add in f32, then ONE downcast of
    # the whole (N, 3E) tensor to the MXU dtype.
    qkv = jnp.dot(x, wqkv_ref[...], preferred_element_type=jnp.float32)
    qkv = (qkv + bqkv_ref[...].astype(jnp.float32)).astype(dot_dtype)     # (N, 3E)

    heads = []
    acc = None
    if not fused_out_proj:
        acc = jnp.zeros((n, e), dtype=jnp.float32)
        wo = wo_ref[...]

    # Static per-head loop (num_heads is small and known at trace time).
    for h in range(num_heads):
        q_h = qkv[:, h * d:(h + 1) * d]                                   # (N, D)
        k_h = qkv[:, e + h * d: e + (h + 1) * d]                          # (N, D)
        v_h = qkv[:, 2 * e + h * d: 2 * e + (h + 1) * d]                  # (N, D)

        # Q @ K^T without an explicit transpose: NT dot_general, f32 accum.
        scores = lax.dot_general(q_h, k_h, (((1,), (1,)), ((), ())),
                                 preferred_element_type=jnp.float32)      # (N, N)

        # Numerically stable softmax statistics in f32.
        scores = scores - jnp.max(scores, axis=-1, keepdims=True)
        if low_precision_exp:
            # bf16 EUP exp (v6e/v7x only); denominator kept in f32.
            p = jnp.exp(scores.astype(dot_dtype))
            row_sum = jnp.sum(p.astype(jnp.float32), axis=-1, keepdims=True)
        else:
            p_f32 = jnp.exp(scores)
            row_sum = jnp.sum(p_f32, axis=-1, keepdims=True)              # (N, 1)
            p = p_f32.astype(dot_dtype)

        o_h = jnp.dot(p, v_h, preferred_element_type=jnp.float32)         # (N, D)
        # Deferred normalisation: one EUP reciprocal of an (N,1) vector plus
        # an (N,D) multiply instead of an NxN divide.
        o_h = o_h * pl.reciprocal(row_sum, approx=True)

        if fused_out_proj:
            heads.append(o_h.astype(dot_dtype))
        else:
            # Fallback path (previous, known-good lowering): accumulate the
            # output projection per head via a static sublane slice of Wo.
            acc = acc + jnp.dot(o_h.astype(dot_dtype), wo[h * d:(h + 1) * d, :],
                                preferred_element_type=jnp.float32)

    if fused_out_proj:
        # Recombine heads and run ONE (N,E)@(E,E) output projection
        # (contraction depth E instead of H matmuls of depth D).
        attn = jnp.concatenate(heads, axis=-1)                            # (N, E)
        acc = jnp.dot(attn, wo_ref[...], preferred_element_type=jnp.float32)

    y = acc + bo_ref[...].astype(jnp.float32)
    out_ref[0] = y.astype(out_ref.dtype)


def _has_bf16_eup():
    """bf16 EUP/VPU exists on v6e/v7x; v2-v5 fall back to the f32 exp path."""
    try:
        kind = jax.devices()[0].device_kind.lower()
    except Exception:
        return False
    return not any(tag in kind for tag in ("v2", "v3", "v4", "v5"))


def _pick_vmem_limit_bytes():
    """Generation-aware scoped-VMEM limit: ~3/4 of physical, capped at 112 MiB."""
    cap = None
    try:
        cap = int(pltpu.get_tpu_info().vmem_capacity_bytes)
    except Exception:
        cap = None
    if not cap:
        try:
            kind = jax.devices()[0].device_kind.lower()
        except Exception:
            kind = ""
        cap = 64 * 1024 * 1024 if "7" in kind else 128 * 1024 * 1024
    return max(32 * 1024 * 1024, min((cap * 3) // 4, 112 * 1024 * 1024))


def prepare_attention_params(params, *, num_heads, dtype):
    """One-time weight preprocessing (call at module init, NOT per forward).

    params hold PyTorch-style (out_features, in_features) weights
    'wq','wk','wv','wo' and biases 'bq','bk','bv','bo'.  Returns the fused,
    pre-transposed weights with 1/tau baked into the Q block.
    """
    E = params["wq"].shape[0]
    assert E % num_heads == 0, "embed_dim must be divisible by num_heads"
    D = E // num_heads
    inv_tau = 1.0 / math.sqrt(float(D))
    f32 = jnp.float32
    wqkv = jnp.concatenate(
        [params["wq"].T.astype(f32) * inv_tau,
         params["wk"].T.astype(f32),
         params["wv"].T.astype(f32)], axis=1).astype(dtype)               # (E, 3E)
    bqkv = jnp.concatenate(
        [params["bq"].astype(f32) * inv_tau,
         params["bk"].astype(f32),
         params["bv"].astype(f32)], axis=0).reshape(1, 3 * E).astype(dtype)  # (1, 3E)
    wo_t = params["wo"].T.astype(dtype)                                   # (E, E)
    bo = params["bo"].reshape(1, E).astype(dtype)                         # (1, E)
    return {"wqkv": wqkv, "bqkv": bqkv, "wo_t": wo_t, "bo": bo}


@functools.lru_cache(maxsize=None)
def _build_pallas_call(*, B, N, E, dtype, num_heads, fused_out_proj,
                       single_buffer_weights, low_precision_exp, vmem_limit_bytes):
    kernel = functools.partial(_attn_kernel, num_heads=num_heads,
                               fused_out_proj=fused_out_proj,
                               low_precision_exp=low_precision_exp)
    # Grid-invariant weights: request single buffering (no point
    # double-buffering constant-index blocks; saves VMEM on v7x's 64 MiB).
    wkw = dict(pipeline_mode=pl.Buffered(1)) if single_buffer_weights else {}
    in_specs = [
        pl.BlockSpec((1, N, E), lambda b: (b, 0, 0)),             # x (per batch)
        pl.BlockSpec((E, 3 * E), lambda b: (0, 0), **wkw),        # Wqkv (resident)
        pl.BlockSpec((1, 3 * E), lambda b: (0, 0), **wkw),        # bqkv
        pl.BlockSpec((E, E), lambda b: (0, 0), **wkw),            # Wo
        pl.BlockSpec((1, E), lambda b: (0, 0), **wkw),            # bo
    ]
    # NOTE(v7x): with grid=(B,) a single-sequence (B==1) call uses only one of
    # the two TensorCores; batch sequences (or add a query-tile parallel axis)
    # before calling this kernel for single-sequence inference on v7x.
    return pl.pallas_call(
        kernel,
        out_shape=jax.ShapeDtypeStruct((B, N, E), dtype),
        grid_spec=pltpu.PrefetchScalarGridSpec(
            num_scalar_prefetch=0,
            grid=(B,),
            in_specs=in_specs,
            out_specs=pl.BlockSpec((1, N, E), lambda b: (b, 0, 0)),
        ),
        compiler_params=pltpu.CompilerParams(
            dimension_semantics=("parallel",),
            vmem_limit_bytes=vmem_limit_bytes,
        ),
    )


def locally_self_attention(x, fused_params, *, num_heads, vmem_limit_bytes=None):
    """Pallas forward of LocallySelfAttention.

    x: (B, N, E).  fused_params is the output of prepare_attention_params().
    Returns (out, None), matching the PyTorch module with need_weights=False
    and attn_mask=None.
    """
    B, N, E = x.shape
    assert E % num_heads == 0, "embed_dim must be divisible by num_heads"
    dtype = x.dtype
    wqkv = fused_params["wqkv"].astype(dtype)   # no-op if prepared in `dtype`
    bqkv = fused_params["bqkv"].astype(dtype)
    wo_t = fused_params["wo_t"].astype(dtype)
    bo = fused_params["bo"].astype(dtype)

    if vmem_limit_bytes is None:
        vmem_limit_bytes = _pick_vmem_limit_bytes()
    low_precision_exp = (dtype == jnp.bfloat16) and _has_bf16_eup()

    # Preferred (optimised) configuration first; fall back to progressively
    # more conservative lowerings if the installed Pallas rejects a feature.
    configs = (
        dict(fused_out_proj=True, single_buffer_weights=True),
        dict(fused_out_proj=True, single_buffer_weights=False),
        dict(fused_out_proj=False, single_buffer_weights=False),
    )
    last_err = None
    for cfg in configs:
        try:
            call = _build_pallas_call(
                B=B, N=N, E=E, dtype=dtype, num_heads=num_heads,
                low_precision_exp=low_precision_exp,
                vmem_limit_bytes=int(vmem_limit_bytes), **cfg)
            out = call(x, wqkv, bqkv, wo_t, bo)
            return out, None
        except Exception as err:   # fallback for older/partial lowerings
            last_err = err
    raise last_err


def _reference(x, params, *, num_heads):
    """Plain-JAX reference mirroring the PyTorch forward (f32)."""
    B, N, E = x.shape
    D = E // num_heads
    tau = math.sqrt(float(D))

    def lin(t, w, b):
        return t @ w.T + b

    q = lin(x, params["wq"], params["bq"]).reshape(B, N, num_heads, D).transpose(0, 2, 1, 3)
    k = lin(x, params["wk"], params["bk"]).reshape(B, N, num_heads, D).transpose(0, 2, 1, 3)
    v = lin(x, params["wv"], params["bv"]).reshape(B, N, num_heads, D).transpose(0, 2, 1, 3)
    scores = jnp.einsum("bhnd,bhmd->bhnm", q, k) / tau
    p = jax.nn.softmax(scores, axis=-1)
    o = jnp.einsum("bhnm,bhmd->bhnd", p, v).transpose(0, 2, 1, 3).reshape(B, N, E)
    return lin(o, params["wo"], params["bo"])


if __name__ == "__main__":
    # Small shapes consistent with the module: batch=2, seq=8, embed_dim=32, heads=4
    B, N, E, H = 2, 8, 32, 4

    key = jax.random.PRNGKey(0)
    keys = jax.random.split(key, 5)
    x = jax.random.normal(keys[0], (B, N, E), dtype=jnp.float32)

    scale = 0.1
    params = {
        "wq": scale * jax.random.normal(keys[1], (E, E), dtype=jnp.float32),
        "wk": scale * jax.random.normal(keys[2], (E, E), dtype=jnp.float32),
        "wv": scale * jax.random.normal(keys[3], (E, E), dtype=jnp.float32),
        "wo": scale * jax.random.normal(keys[4], (E, E), dtype=jnp.float32),
        "bq": jnp.zeros((E,), dtype=jnp.float32),
        "bk": jnp.zeros((E,), dtype=jnp.float32),
        "bv": jnp.zeros((E,), dtype=jnp.float32),
        "bo": jnp.zeros((E,), dtype=jnp.float32),
    }

    ref = _reference(x, params, num_heads=H)

    # f32 path (matches the PyTorch module's default dtype).  Tolerance 2e-3
    # because the softmax denominator uses the approximate EUP reciprocal.
    fused_f32 = prepare_attention_params(params, num_heads=H, dtype=jnp.float32)
    out_f32, weights = locally_self_attention(x, fused_f32, num_heads=H)
    out_f32 = jax.block_until_ready(out_f32)
    assert out_f32.shape == (B, N, E)
    assert weights is None
    assert jnp.allclose(out_f32, ref, atol=2e-3, rtol=2e-3), "f32 mismatch vs reference"

    # bf16 MXU path (recommended default on v5e): bf16 dots, f32 softmax
    # statistics and f32 accumulation inside the kernel.
    fused_bf16 = prepare_attention_params(params, num_heads=H, dtype=jnp.bfloat16)
    out_bf16, _ = locally_self_attention(x.astype(jnp.bfloat16), fused_bf16, num_heads=H)
    out_bf16 = jax.block_until_ready(out_bf16)
    assert out_bf16.shape == (B, N, E)
    assert jnp.allclose(out_bf16.astype(jnp.float32), ref, atol=5e-2, rtol=5e-2), \
        "bf16 mismatch vs reference"

    print("KERNEL_OK")
</pallas_src>

<mosaic_0001>
module attributes {stable_mosaic.version = 11 : i64} {
  func.func @_attn_kernel(%arg0: i32, %arg1: memref<1x8x32xf32, #tpu.memory_space<vmem>>, %arg2: memref<32x96xf32, #tpu.memory_space<vmem>>, %arg3: memref<1x96xf32, #tpu.memory_space<vmem>>, %arg4: memref<32x32xf32, #tpu.memory_space<vmem>>, %arg5: memref<1x32xf32, #tpu.memory_space<vmem>>, %arg6: memref<1x8x32xf32, #tpu.memory_space<vmem>>) attributes {dimension_semantics = [#tpu.dimension_semantics<parallel>], iteration_bounds = array<i64: 2>, scalar_prefetch = 0 : i64, scratch_operands = 0 : i64, tpu.core_type = #tpu.core_type<tc>, window_params = [{transform_indices = @transform_0, window_bounds = array<i64: 1, 8, 32>}, {pipeline_mode = #tpu.pipeline_mode<synchronous>, transform_indices = @transform_1, window_bounds = array<i64: 32, 96>}, {pipeline_mode = #tpu.pipeline_mode<synchronous>, transform_indices = @transform_2, window_bounds = array<i64: 1, 96>}, {pipeline_mode = #tpu.pipeline_mode<synchronous>, transform_indices = @transform_3, window_bounds = array<i64: 32, 32>}, {pipeline_mode = #tpu.pipeline_mode<synchronous>, transform_indices = @transform_4, window_bounds = array<i64: 1, 32>}, {transform_indices = @transform_5, window_bounds = array<i64: 1, 8, 32>}]} {
    %c0 = arith.constant 0 : index
    %c0_0 = arith.constant 0 : index
    %c0_1 = arith.constant 0 : index
    %0 = vector.load %arg1[%c0, %c0_0, %c0_1] : memref<1x8x32xf32, #tpu.memory_space<vmem>>, vector<1x8x32xf32>
    %1 = vector.shape_cast %0 : vector<1x8x32xf32> to vector<8x32xf32>
    %c0_2 = arith.constant 0 : index
    %c0_3 = arith.constant 0 : index
    %2 = vector.load %arg2[%c0_2, %c0_3] : memref<32x96xf32, #tpu.memory_space<vmem>>, vector<32x96xf32>
    %cst = arith.constant dense<0.000000e+00> : vector<8x96xf32>
    %3 = tpu.matmul %1, %2, %cst {dimension_numbers = #tpu.dot_dimension_numbers<[1], [0], [0], [1], [0, 0, 1, 1], [], []>} : vector<8x32xf32>, vector<32x96xf32>, vector<8x96xf32> -> vector<8x96xf32>
    %c0_4 = arith.constant 0 : index
    %c0_5 = arith.constant 0 : index
    %4 = vector.load %arg3[%c0_4, %c0_5] : memref<1x96xf32, #tpu.memory_space<vmem>>, vector<1x96xf32>
    %5 = vector.broadcast %4 : vector<1x96xf32> to vector<8x96xf32>
    %6 = arith.addf %3, %5 : vector<8x96xf32>
    %7 = vector.extract_strided_slice %6 {offsets = [0, 0], sizes = [8, 8], strides = [1, 1]} : vector<8x96xf32> to vector<8x8xf32>
    %8 = vector.extract_strided_slice %6 {offsets = [0, 32], sizes = [8, 8], strides = [1, 1]} : vector<8x96xf32> to vector<8x8xf32>
    %9 = vector.extract_strided_slice %6 {offsets = [0, 64], sizes = [8, 8], strides = [1, 1]} : vector<8x96xf32> to vector<8x8xf32>
    %cst_6 = arith.constant dense<0.000000e+00> : vector<8x8xf32>
    %10 = tpu.matmul %7, %8, %cst_6 {dimension_numbers = #tpu.dot_dimension_numbers<[1], [1], [0], [0], [0, 0, 1, 0], [], []>} : vector<8x8xf32>, vector<8x8xf32>, vector<8x8xf32> -> vector<8x8xf32>
    %cst_7 = arith.constant dense<0xFF800000> : vector<8xf32>
    %11 = vector.multi_reduction <maximumf>, %10, %cst_7 [1] : vector<8x8xf32> to vector<8xf32>
    %12 = vector.shape_cast %11 : vector<8xf32> to vector<8x1xf32>
    %13 = vector.broadcast %12 : vector<8x1xf32> to vector<8x8xf32>
    %14 = arith.subf %10, %13 : vector<8x8xf32>
    %15 = math.exp %14 : vector<8x8xf32>
    %cst_8 = arith.constant dense<0.000000e+00> : vector<8xf32>
    %16 = vector.multi_reduction <add>, %15, %cst_8 [1] : vector<8x8xf32> to vector<8xf32>
    %17 = vector.shape_cast %16 : vector<8xf32> to vector<8x1xf32>
    %cst_9 = arith.constant dense<0.000000e+00> : vector<8x8xf32>
    %18 = tpu.matmul %15, %9, %cst_9 {dimension_numbers = #tpu.dot_dimension_numbers<[1], [0], [0], [1], [0, 0, 1, 1], [], []>} : vector<8x8xf32>, vector<8x8xf32>, vector<8x8xf32> -> vector<8x8xf32>
    %19 = tpu.reciprocal %17 {approx = true} : vector<8x1xf32> -> vector<8x1xf32>
    %20 = vector.broadcast %19 : vector<8x1xf32> to vector<8x8xf32>
    %21 = arith.mulf %18, %20 : vector<8x8xf32>
    %22 = vector.extract_strided_slice %6 {offsets = [0, 8], sizes = [8, 8], strides = [1, 1]} : vector<8x96xf32> to vector<8x8xf32>
    %23 = vector.extract_strided_slice %6 {offsets = [0, 40], sizes = [8, 8], strides = [1, 1]} : vector<8x96xf32> to vector<8x8xf32>
    %24 = vector.extract_strided_slice %6 {offsets = [0, 72], sizes = [8, 8], strides = [1, 1]} : vector<8x96xf32> to vector<8x8xf32>
    %cst_10 = arith.constant dense<0.000000e+00> : vector<8x8xf32>
    %25 = tpu.matmul %22, %23, %cst_10 {dimension_numbers = #tpu.dot_dimension_numbers<[1], [1], [0], [0], [0, 0, 1, 0], [], []>} : vector<8x8xf32>, vector<8x8xf32>, vector<8x8xf32> -> vector<8x8xf32>
    %cst_11 = arith.constant dense<0xFF800000> : vector<8xf32>
    %26 = vector.multi_reduction <maximumf>, %25, %cst_11 [1] : vector<8x8xf32> to vector<8xf32>
    %27 = vector.shape_cast %26 : vector<8xf32> to vector<8x1xf32>
    %28 = vector.broadcast %27 : vector<8x1xf32> to vector<8x8xf32>
    %29 = arith.subf %25, %28 : vector<8x8xf32>
    %30 = math.exp %29 : vector<8x8xf32>
    %cst_12 = arith.constant dense<0.000000e+00> : vector<8xf32>
    %31 = vector.multi_reduction <add>, %30, %cst_12 [1] : vector<8x8xf32> to vector<8xf32>
    %32 = vector.shape_cast %31 : vector<8xf32> to vector<8x1xf32>
    %cst_13 = arith.constant dense<0.000000e+00> : vector<8x8xf32>
    %33 = tpu.matmul %30, %24, %cst_13 {dimension_numbers = #tpu.dot_dimension_numbers<[1], [0], [0], [1], [0, 0, 1, 1], [], []>} : vector<8x8xf32>, vector<8x8xf32>, vector<8x8xf32> -> vector<8x8xf32>
    %34 = tpu.reciprocal %32 {approx = true} : vector<8x1xf32> -> vector<8x1xf32>
    %35 = vector.broadcast %34 : vector<8x1xf32> to vector<8x8xf32>
    %36 = arith.mulf %33, %35 : vector<8x8xf32>
    %37 = vector.extract_strided_slice %6 {offsets = [0, 16], sizes = [8, 8], strides = [1, 1]} : vector<8x96xf32> to vector<8x8xf32>
    %38 = vector.extract_strided_slice %6 {offsets = [0, 48], sizes = [8, 8], strides = [1, 1]} : vector<8x96xf32> to vector<8x8xf32>
    %39 = vector.extract_strided_slice %6 {offsets = [0, 80], sizes = [8, 8], strides = [1, 1]} : vector<8x96xf32> to vector<8x8xf32>
    %cst_14 = arith.constant dense<0.000000e+00> : vector<8x8xf32>
    %40 = tpu.matmul %37, %38, %cst_14 {dimension_numbers = #tpu.dot_dimension_numbers<[1], [1], [0], [0], [0, 0, 1, 0], [], []>} : vector<8x8xf32>, vector<8x8xf32>, vector<8x8xf32> -> vector<8x8xf32>
    %cst_15 = arith.constant dense<0xFF800000> : vector<8xf32>
    %41 = vector.multi_reduction <maximumf>, %40, %cst_15 [1] : vector<8x8xf32> to vector<8xf32>
    %42 = vector.shape_cast %41 : vector<8xf32> to vector<8x1xf32>
    %43 = vector.broadcast %42 : vector<8x1xf32> to vector<8x8xf32>
    %44 = arith.subf %40, %43 : vector<8x8xf32>
    %45 = math.exp %44 : vector<8x8xf32>
    %cst_16 = arith.constant dense<0.000000e+00> : vector<8xf32>
    %46 = vector.multi_reduction <add>, %45, %cst_16 [1] : vector<8x8xf32> to vector<8xf32>
    %47 = vector.shape_cast %46 : vector<8xf32> to vector<8x1xf32>
    %cst_17 = arith.constant dense<0.000000e+00> : vector<8x8xf32>
    %48 = tpu.matmul %45, %39, %cst_17 {dimension_numbers = #tpu.dot_dimension_numbers<[1], [0], [0], [1], [0, 0, 1, 1], [], []>} : vector<8x8xf32>, vector<8x8xf32>, vector<8x8xf32> -> vector<8x8xf32>
    %49 = tpu.reciprocal %47 {approx = true} : vector<8x1xf32> -> vector<8x1xf32>
    %50 = vector.broadcast %49 : vector<8x1xf32> to vector<8x8xf32>
    %51 = arith.mulf %48, %50 : vector<8x8xf32>
    %52 = vector.extract_strided_slice %6 {offsets = [0, 24], sizes = [8, 8], strides = [1, 1]} : vector<8x96xf32> to vector<8x8xf32>
    %53 = vector.extract_strided_slice %6 {offsets = [0, 56], sizes = [8, 8], strides = [1, 1]} : vector<8x96xf32> to vector<8x8xf32>
    %54 = vector.extract_strided_slice %6 {offsets = [0, 88], sizes = [8, 8], strides = [1, 1]} : vector<8x96xf32> to vector<8x8xf32>
    %cst_18 = arith.constant dense<0.000000e+00> : vector<8x8xf32>
    %55 = tpu.matmul %52, %53, %cst_18 {dimension_numbers = #tpu.dot_dimension_numbers<[1], [1], [0], [0], [0, 0, 1, 0], [], []>} : vector<8x8xf32>, vector<8x8xf32>, vector<8x8xf32> -> vector<8x8xf32>
    %cst_19 = arith.constant dense<0xFF800000> : vector<8xf32>
    %56 = vector.multi_reduction <maximumf>, %55, %cst_19 [1] : vector<8x8xf32> to vector<8xf32>
    %57 = vector.shape_cast %56 : vector<8xf32> to vector<8x1xf32>
    %58 = vector.broadcast %57 : vector<8x1xf32> to vector<8x8xf32>
    %59 = arith.subf %55, %58 : vector<8x8xf32>
    %60 = math.exp %59 : vector<8x8xf32>
    %cst_20 = arith.constant dense<0.000000e+00> : vector<8xf32>
    %61 = vector.multi_reduction <add>, %60, %cst_20 [1] : vector<8x8xf32> to vector<8xf32>
    %62 = vector.shape_cast %61 : vector<8xf32> to vector<8x1xf32>
    %cst_21 = arith.constant dense<0.000000e+00> : vector<8x8xf32>
    %63 = tpu.matmul %60, %54, %cst_21 {dimension_numbers = #tpu.dot_dimension_numbers<[1], [0], [0], [1], [0, 0, 1, 1], [], []>} : vector<8x8xf32>, vector<8x8xf32>, vector<8x8xf32> -> vector<8x8xf32>
    %64 = tpu.reciprocal %62 {approx = true} : vector<8x1xf32> -> vector<8x1xf32>
    %65 = vector.broadcast %64 : vector<8x1xf32> to vector<8x8xf32>
    %66 = arith.mulf %63, %65 : vector<8x8xf32>
    %67 = tpu.concatenate %21, %36, %51, %66 in 1 : vector<8x8xf32>, vector<8x8xf32>, vector<8x8xf32>, vector<8x8xf32> -> vector<8x32xf32>
    %c0_22 = arith.constant 0 : index
    %c0_23 = arith.constant 0 : index
    %68 = vector.load %arg4[%c0_22, %c0_23] : memref<32x32xf32, #tpu.memory_space<vmem>>, vector<32x32xf32>
    %cst_24 = arith.constant dense<0.000000e+00> : vector<8x32xf32>
    %69 = tpu.matmul %67, %68, %cst_24 {dimension_numbers = #tpu.dot_dimension_numbers<[1], [0], [0], [1], [0, 0, 1, 1], [], []>} : vector<8x32xf32>, vector<32x32xf32>, vector<8x32xf32> -> vector<8x32xf32>
    %c0_25 = arith.constant 0 : index
    %c0_26 = arith.constant 0 : index
    %70 = vector.load %arg5[%c0_25, %c0_26] : memref<1x32xf32, #tpu.memory_space<vmem>>, vector<1x32xf32>
    %71 = vector.broadcast %70 : vector<1x32xf32> to vector<8x32xf32>
    %72 = arith.addf %69, %71 : vector<8x32xf32>
    %c0_27 = arith.constant 0 : index
    %c0_28 = arith.constant 0 : index
    %c0_29 = arith.constant 0 : index
    %73 = vector.load %arg6[%c0_27, %c0_28, %c0_29] : memref<1x8x32xf32, #tpu.memory_space<vmem>>, vector<1x8x32xf32>
    %74 = vector.shape_cast %73 : vector<1x8x32xf32> to vector<8x32xf32>
    %75 = vector.shape_cast %72 : vector<8x32xf32> to vector<1x8x32xf32>
    tpu.vector_store %arg6[%c0_27, %c0_28, %c0_29], %75 {strides = array<i32>} : memref<1x8x32xf32, #tpu.memory_space<vmem>>, vector<1x8x32xf32>,
    return
  }
  func.func @transform_0(%arg0: i32) -> (i32, i32, i32) {
    %c0_i32 = arith.constant 0 : i32
    %c0_i32_0 = arith.constant 0 : i32
    %c0_i32_1 = arith.constant 0 : i32
    return %arg0, %c0_i32, %c0_i32_0 : i32, i32, i32
  }
  func.func @transform_1(%arg0: i32) -> (i32, i32) {
    %c0_i32 = arith.constant 0 : i32
    %c0_i32_0 = arith.constant 0 : i32
    %c0_i32_1 = arith.constant 0 : i32
    return %c0_i32, %c0_i32_0 : i32, i32
  }
  func.func @transform_2(%arg0: i32) -> (i32, i32) {
    %c0_i32 = arith.constant 0 : i32
    %c0_i32_0 = arith.constant 0 : i32
    %c0_i32_1 = arith.constant 0 : i32
    return %c0_i32, %c0_i32_0 : i32, i32
  }
  func.func @transform_3(%arg0: i32) -> (i32, i32) {
    %c0_i32 = arith.constant 0 : i32
    %c0_i32_0 = arith.constant 0 : i32
    %c0_i32_1 = arith.constant 0 : i32
    return %c0_i32, %c0_i32_0 : i32, i32
  }
  func.func @transform_4(%arg0: i32) -> (i32, i32) {
    %c0_i32 = arith.constant 0 : i32
    %c0_i32_0 = arith.constant 0 : i32
    %c0_i32_1 = arith.constant 0 : i32
    return %c0_i32, %c0_i32_0 : i32, i32
  }
  func.func @transform_5(%arg0: i32) -> (i32, i32, i32) {
    %c0_i32 = arith.constant 0 : i32
    %c0_i32_0 = arith.constant 0 : i32
    %c0_i32_1 = arith.constant 0 : i32
    return %arg0, %c0_i32, %c0_i32_0 : i32, i32, i32
  }
}

module attributes {stable_mosaic.version = 11 : i64} {
  func.func @_attn_kernel(%arg0: i32, %arg1: memref<1x8x32xf32, #tpu.memory_space<vmem>>, %arg2: memref<32x96xf32, #tpu.memory_space<vmem>>, %arg3: memref<1x96xf32, #tpu.memory_space<vmem>>, %arg4: memref<32x32xf32, #tpu.memory_space<vmem>>, %arg5: memref<1x32xf32, #tpu.memory_space<vmem>>, %arg6: memref<1x8x32xf32, #tpu.memory_space<vmem>>) attributes {dimension_semantics = [#tpu.dimension_semantics<parallel>], iteration_bounds = array<i64: 2>, scalar_prefetch = 0 : i64, scratch_operands = 0 : i64, tpu.core_type = #tpu.core_type<tc>, window_params = [{transform_indices = @transform_0, window_bounds = array<i64: 1, 8, 32>}, {pipeline_mode = #tpu.pipeline_mode<synchronous>, transform_indices = @transform_1, window_bounds = array<i64: 32, 96>}, {pipeline_mode = #tpu.pipeline_mode<synchronous>, transform_indices = @transform_2, window_bounds = array<i64: 1, 96>}, {pipeline_mode = #tpu.pipeline_mode<synchronous>, transform_indices = @transform_3, window_bounds = array<i64: 32, 32>}, {pipeline_mode = #tpu.pipeline_mode<synchronous>, transform_indices = @transform_4, window_bounds = array<i64: 1, 32>}, {transform_indices = @transform_5, window_bounds = array<i64: 1, 8, 32>}]} {
    %c0 = arith.constant 0 : index
    %c0_0 = arith.constant 0 : index
    %c0_1 = arith.constant 0 : index
    %0 = vector.load %arg1[%c0, %c0_0, %c0_1] : memref<1x8x32xf32, #tpu.memory_space<vmem>>, vector<1x8x32xf32>
    %1 = vector.shape_cast %0 : vector<1x8x32xf32> to vector<8x32xf32>
    %c0_2 = arith.constant 0 : index
    %c0_3 = arith.constant 0 : index
    %2 = vector.load %arg2[%c0_2, %c0_3] : memref<32x96xf32, #tpu.memory_space<vmem>>, vector<32x96xf32>
    %cst = arith.constant dense<0.000000e+00> : vector<8x96xf32>
    %3 = tpu.matmul %1, %2, %cst {dimension_numbers = #tpu.dot_dimension_numbers<[1], [0], [0], [1], [0, 0, 1, 1], [], []>} : vector<8x32xf32>, vector<32x96xf32>, vector<8x96xf32> -> vector<8x96xf32>
    %c0_4 = arith.constant 0 : index
    %c0_5 = arith.constant 0 : index
    %4 = vector.load %arg3[%c0_4, %c0_5] : memref<1x96xf32, #tpu.memory_space<vmem>>, vector<1x96xf32>
    %5 = vector.broadcast %4 : vector<1x96xf32> to vector<8x96xf32>
    %6 = arith.addf %3, %5 : vector<8x96xf32>
    %7 = vector.extract_strided_slice %6 {offsets = [0, 0], sizes = [8, 8], strides = [1, 1]} : vector<8x96xf32> to vector<8x8xf32>
    %8 = vector.extract_strided_slice %6 {offsets = [0, 32], sizes = [8, 8], strides = [1, 1]} : vector<8x96xf32> to vector<8x8xf32>
    %9 = vector.extract_strided_slice %6 {offsets = [0, 64], sizes = [8, 8], strides = [1, 1]} : vector<8x96xf32> to vector<8x8xf32>
    %cst_6 = arith.constant dense<0.000000e+00> : vector<8x8xf32>
    %10 = tpu.matmul %7, %8, %cst_6 {dimension_numbers = #tpu.dot_dimension_numbers<[1], [1], [0], [0], [0, 0, 1, 0], [], []>} : vector<8x8xf32>, vector<8x8xf32>, vector<8x8xf32> -> vector<8x8xf32>
    %cst_7 = arith.constant dense<0xFF800000> : vector<8xf32>
    %11 = vector.multi_reduction <maximumf>, %10, %cst_7 [1] : vector<8x8xf32> to vector<8xf32>
    %12 = vector.shape_cast %11 : vector<8xf32> to vector<8x1xf32>
    %13 = vector.broadcast %12 : vector<8x1xf32> to vector<8x8xf32>
    %14 = arith.subf %10, %13 : vector<8x8xf32>
    %15 = math.exp %14 : vector<8x8xf32>
    %cst_8 = arith.constant dense<0.000000e+00> : vector<8xf32>
    %16 = vector.multi_reduction <add>, %15, %cst_8 [1] : vector<8x8xf32> to vector<8xf32>
    %17 = vector.shape_cast %16 : vector<8xf32> to vector<8x1xf32>
    %cst_9 = arith.constant dense<0.000000e+00> : vector<8x8xf32>
    %18 = tpu.matmul %15, %9, %cst_9 {dimension_numbers = #tpu.dot_dimension_numbers<[1], [0], [0], [1], [0, 0, 1, 1], [], []>} : vector<8x8xf32>, vector<8x8xf32>, vector<8x8xf32> -> vector<8x8xf32>
    %19 = tpu.reciprocal %17 {approx = true} : vector<8x1xf32> -> vector<8x1xf32>
    %20 = vector.broadcast %19 : vector<8x1xf32> to vector<8x8xf32>
    %21 = arith.mulf %18, %20 : vector<8x8xf32>
    %22 = vector.extract_strided_slice %6 {offsets = [0, 8], sizes = [8, 8], strides = [1, 1]} : vector<8x96xf32> to vector<8x8xf32>
    %23 = vector.extract_strided_slice %6 {offsets = [0, 40], sizes = [8, 8], strides = [1, 1]} : vector<8x96xf32> to vector<8x8xf32>
    %24 = vector.extract_strided_slice %6 {offsets = [0, 72], sizes = [8, 8], strides = [1, 1]} : vector<8x96xf32> to vector<8x8xf32>
    %cst_10 = arith.constant dense<0.000000e+00> : vector<8x8xf32>
    %25 = tpu.matmul %22, %23, %cst_10 {dimension_numbers = #tpu.dot_dimension_numbers<[1], [1], [0], [0], [0, 0, 1, 0], [], []>} : vector<8x8xf32>, vector<8x8xf32>, vector<8x8xf32> -> vector<8x8xf32>
    %cst_11 = arith.constant dense<0xFF800000> : vector<8xf32>
    %26 = vector.multi_reduction <maximumf>, %25, %cst_11 [1] : vector<8x8xf32> to vector<8xf32>
    %27 = vector.shape_cast %26 : vector<8xf32> to vector<8x1xf32>
    %28 = vector.broadcast %27 : vector<8x1xf32> to vector<8x8xf32>
    %29 = arith.subf %25, %28 : vector<8x8xf32>
    %30 = math.exp %29 : vector<8x8xf32>
    %cst_12 = arith.constant dense<0.000000e+00> : vector<8xf32>
    %31 = vector.multi_reduction <add>, %30, %cst_12 [1] : vector<8x8xf32> to vector<8xf32>
    %32 = vector.shape_cast %31 : vector<8xf32> to vector<8x1xf32>
    %cst_13 = arith.constant dense<0.000000e+00> : vector<8x8xf32>
    %33 = tpu.matmul %30, %24, %cst_13 {dimension_numbers = #tpu.dot_dimension_numbers<[1], [0], [0], [1], [0, 0, 1, 1], [], []>} : vector<8x8xf32>, vector<8x8xf32>, vector<8x8xf32> -> vector<8x8xf32>
    %34 = tpu.reciprocal %32 {approx = true} : vector<8x1xf32> -> vector<8x1xf32>
    %35 = vector.broadcast %34 : vector<8x1xf32> to vector<8x8xf32>
    %36 = arith.mulf %33, %35 : vector<8x8xf32>
    %37 = vector.extract_strided_slice %6 {offsets = [0, 16], sizes = [8, 8], strides = [1, 1]} : vector<8x96xf32> to vector<8x8xf32>
    %38 = vector.extract_strided_slice %6 {offsets = [0, 48], sizes = [8, 8], strides = [1, 1]} : vector<8x96xf32> to vector<8x8xf32>
    %39 = vector.extract_strided_slice %6 {offsets = [0, 80], sizes = [8, 8], strides = [1, 1]} : vector<8x96xf32> to vector<8x8xf32>
    %cst_14 = arith.constant dense<0.000000e+00> : vector<8x8xf32>
    %40 = tpu.matmul %37, %38, %cst_14 {dimension_numbers = #tpu.dot_dimension_numbers<[1], [1], [0], [0], [0, 0, 1, 0], [], []>} : vector<8x8xf32>, vector<8x8xf32>, vector<8x8xf32> -> vector<8x8xf32>
    %cst_15 = arith.constant dense<0xFF800000> : vector<8xf32>
    %41 = vector.multi_reduction <maximumf>, %40, %cst_15 [1] : vector<8x8xf32> to vector<8xf32>
    %42 = vector.shape_cast %41 : vector<8xf32> to vector<8x1xf32>
    %43 = vector.broadcast %42 : vector<8x1xf32> to vector<8x8xf32>
    %44 = arith.subf %40, %43 : vector<8x8xf32>
    %45 = math.exp %44 : vector<8x8xf32>
    %cst_16 = arith.constant dense<0.000000e+00> : vector<8xf32>
    %46 = vector.multi_reduction <add>, %45, %cst_16 [1] : vector<8x8xf32> to vector<8xf32>
    %47 = vector.shape_cast %46 : vector<8xf32> to vector<8x1xf32>
    %cst_17 = arith.constant dense<0.000000e+00> : vector<8x8xf32>
    %48 = tpu.matmul %45, %39, %cst_17 {dimension_numbers = #tpu.dot_dimension_numbers<[1], [0], [0], [1], [0, 0, 1, 1], [], []>} : vector<8x8xf32>, vector<8x8xf32>, vector<8x8xf32> -> vector<8x8xf32>
    %49 = tpu.reciprocal %47 {approx = true} : vector<8x1xf32> -> vector<8x1xf32>
    %50 = vector.broadcast %49 : vector<8x1xf32> to vector<8x8xf32>
    %51 = arith.mulf %48, %50 : vector<8x8xf32>
    %52 = vector.extract_strided_slice %6 {offsets = [0, 24], sizes = [8, 8], strides = [1, 1]} : vector<8x96xf32> to vector<8x8xf32>
    %53 = vector.extract_strided_slice %6 {offsets = [0, 56], sizes = [8, 8], strides = [1, 1]} : vector<8x96xf32> to vector<8x8xf32>
    %54 = vector.extract_strided_slice %6 {offsets = [0, 88], sizes = [8, 8], strides = [1, 1]} : vector<8x96xf32> to vector<8x8xf32>
    %cst_18 = arith.constant dense<0.000000e+00> : vector<8x8xf32>
    %55 = tpu.matmul %52, %53, %cst_18 {dimension_numbers = #tpu.dot_dimension_numbers<[1], [1], [0], [0], [0, 0, 1, 0], [], []>} : vector<8x8xf32>, vector<8x8xf32>, vector<8x8xf32> -> vector<8x8xf32>
    %cst_19 = arith.constant dense<0xFF800000> : vector<8xf32>
    %56 = vector.multi_reduction <maximumf>, %55, %cst_19 [1] : vector<8x8xf32> to vector<8xf32>
    %57 = vector.shape_cast %56 : vector<8xf32> to vector<8x1xf32>
    %58 = vector.broadcast %57 : vector<8x1xf32> to vector<8x8xf32>
    %59 = arith.subf %55, %58 : vector<8x8xf32>
    %60 = math.exp %59 : vector<8x8xf32>
    %cst_20 = arith.constant dense<0.000000e+00> : vector<8xf32>
    %61 = vector.multi_reduction <add>, %60, %cst_20 [1] : vector<8x8xf32> to vector<8xf32>
    %62 = vector.shape_cast %61 : vector<8xf32> to vector<8x1xf32>
    %cst_21 = arith.constant dense<0.000000e+00> : vector<8x8xf32>
    %63 = tpu.matmul %60, %54, %cst_21 {dimension_numbers = #tpu.dot_dimension_numbers<[1], [0], [0], [1], [0, 0, 1, 1], [], []>} : vector<8x8xf32>, vector<8x8xf32>, vector<8x8xf32> -> vector<8x8xf32>
    %64 = tpu.reciprocal %62 {approx = true} : vector<8x1xf32> -> vector<8x1xf32>
    %65 = vector.broadcast %64 : vector<8x1xf32> to vector<8x8xf32>
    %66 = arith.mulf %63, %65 : vector<8x8xf32>
    %67 = tpu.concatenate %21, %36, %51, %66 in 1 : vector<8x8xf32>, vector<8x8xf32>, vector<8x8xf32>, vector<8x8xf32> -> vector<8x32xf32>
    %c0_22 = arith.constant 0 : index
    %c0_23 = arith.constant 0 : index
    %68 = vector.load %arg4[%c0_22, %c0_23] : memref<32x32xf32, #tpu.memory_space<vmem>>, vector<32x32xf32>
    %cst_24 = arith.constant dense<0.000000e+00> : vector<8x32xf32>
    %69 = tpu.matmul %67, %68, %cst_24 {dimension_numbers = #tpu.dot_dimension_numbers<[1], [0], [0], [1], [0, 0, 1, 1], [], []>} : vector<8x32xf32>, vector<32x32xf32>, vector<8x32xf32> -> vector<8x32xf32>
    %c0_25 = arith.constant 0 : index
    %c0_26 = arith.constant 0 : index
    %70 = vector.load %arg5[%c0_25, %c0_26] : memref<1x32xf32, #tpu.memory_space<vmem>>, vector<1x32xf32>
    %71 = vector.broadcast %70 : vector<1x32xf32> to vector<8x32xf32>
    %72 = arith.addf %69, %71 : vector<8x32xf32>
    %c0_27 = arith.constant 0 : index
    %c0_28 = arith.constant 0 : index
    %c0_29 = arith.constant 0 : index
    %73 = vector.load %arg6[%c0_27, %c0_28, %c0_29] : memref<1x8x32xf32, #tpu.memory_space<vmem>>, vector<1x8x32xf32>
    %74 = vector.shape_cast %73 : vector<1x8x32xf32> to vector<8x32xf32>
    %75 = vector.shape_cast %72 : vector<8x32xf32> to vector<1x8x32xf32>
    tpu.vector_store %arg6[%c0_27, %c0_28, %c0_29], %75 {strides = array<i32>} : memref<1x8x32xf32, #tpu.memory_space<vmem>>, vector<1x8x32xf32>,
    return
  }
  func.func @transform_0(%arg0: i32) -> (i32, i32, i32) {
    %c0_i32 = arith.constant 0 : i32
    %c0_i32_0 = arith.constant 0 : i32
    %c0_i32_1 = arith.constant 0 : i32
    return %arg0, %c0_i32, %c0_i32_0 : i32, i32, i32
  }
  func.func @transform_1(%arg0: i32) -> (i32, i32) {
    %c0_i32 = arith.constant 0 : i32
    %c0_i32_0 = arith.constant 0 : i32
    %c0_i32_1 = arith.constant 0 : i32
    return %c0_i32, %c0_i32_0 : i32, i32
  }
  func.func @transform_2(%arg0: i32) -> (i32, i32) {
    %c0_i32 = arith.constant 0 : i32
    %c0_i32_0 = arith.constant 0 : i32
    %c0_i32_1 = arith.constant 0 : i32
    return %c0_i32, %c0_i32_0 : i32, i32
  }
  func.func @transform_3(%arg0: i32) -> (i32, i32) {
    %c0_i32 = arith.constant 0 : i32
    %c0_i32_0 = arith.constant 0 : i32
    %c0_i32_1 = arith.constant 0 : i32
    return %c0_i32, %c0_i32_0 : i32, i32
  }
  func.func @transform_4(%arg0: i32) -> (i32, i32) {
    %c0_i32 = arith.constant 0 : i32
    %c0_i32_0 = arith.constant 0 : i32
    %c0_i32_1 = arith.constant 0 : i32
    return %c0_i32, %c0_i32_0 : i32, i32
  }
  func.func @transform_5(%arg0: i32) -> (i32, i32, i32) {
    %c0_i32 = arith.constant 0 : i32
    %c0_i32_0 = arith.constant 0 : i32
    %c0_i32_1 = arith.constant 0 : i32
    return %arg0, %c0_i32, %c0_i32_0 : i32, i32, i32
  }
}

module attributes {stable_mosaic.version = 11 : i64} {
  func.func @_attn_kernel(%arg0: i32, %arg1: memref<1x8x32xf32, #tpu.memory_space<vmem>>, %arg2: memref<32x96xf32, #tpu.memory_space<vmem>>, %arg3: memref<1x96xf32, #tpu.memory_space<vmem>>, %arg4: memref<32x32xf32, #tpu.memory_space<vmem>>, %arg5: memref<1x32xf32, #tpu.memory_space<vmem>>, %arg6: memref<1x8x32xf32, #tpu.memory_space<vmem>>) attributes {dimension_semantics = [#tpu.dimension_semantics<parallel>], iteration_bounds = array<i64: 2>, scalar_prefetch = 0 : i64, scratch_operands = 0 : i64, tpu.core_type = #tpu.core_type<tc>, window_params = [{transform_indices = @transform_0, window_bounds = array<i64: 1, 8, 32>}, {pipeline_mode = #tpu.pipeline_mode<synchronous>, transform_indices = @transform_1, window_bounds = array<i64: 32, 96>}, {pipeline_mode = #tpu.pipeline_mode<synchronous>, transform_indices = @transform_2, window_bounds = array<i64: 1, 96>}, {pipeline_mode = #tpu.pipeline_mode<synchronous>, transform_indices = @transform_3, window_bounds = array<i64: 32, 32>}, {pipeline_mode = #tpu.pipeline_mode<synchronous>, transform_indices = @transform_4, window_bounds = array<i64: 1, 32>}, {transform_indices = @transform_5, window_bounds = array<i64: 1, 8, 32>}]} {
    %c0 = arith.constant 0 : index
    %c0_0 = arith.constant 0 : index
    %c0_1 = arith.constant 0 : index
    %0 = vector.load %arg1[%c0, %c0_0, %c0_1] : memref<1x8x32xf32, #tpu.memory_space<vmem>>, vector<1x8x32xf32>
    %1 = vector.shape_cast %0 : vector<1x8x32xf32> to vector<8x32xf32>
    %c0_2 = arith.constant 0 : index
    %c0_3 = arith.constant 0 : index
    %2 = vector.load %arg2[%c0_2, %c0_3] : memref<32x96xf32, #tpu.memory_space<vmem>>, vector<32x96xf32>
    %cst = arith.constant dense<0.000000e+00> : vector<8x96xf32>
    %3 = tpu.matmul %1, %2, %cst {dimension_numbers = #tpu.dot_dimension_numbers<[1], [0], [0], [1], [0, 0, 1, 1], [], []>} : vector<8x32xf32>, vector<32x96xf32>, vector<8x96xf32> -> vector<8x96xf32>
    %c0_4 = arith.constant 0 : index
    %c0_5 = arith.constant 0 : index
    %4 = vector.load %arg3[%c0_4, %c0_5] : memref<1x96xf32, #tpu.memory_space<vmem>>, vector<1x96xf32>
    %5 = vector.broadcast %4 : vector<1x96xf32> to vector<8x96xf32>
    %6 = arith.addf %3, %5 : vector<8x96xf32>
    %cst_6 = arith.constant 0.000000e+00 : f32
    %7 = vector.broadcast %cst_6 : f32 to vector<8x32xf32>
    %c0_7 = arith.constant 0 : index
    %c0_8 = arith.constant 0 : index
    %8 = vector.load %arg4[%c0_7, %c0_8] : memref<32x32xf32, #tpu.memory_space<vmem>>, vector<32x32xf32>
    %9 = vector.extract_strided_slice %6 {offsets = [0, 0], sizes = [8, 8], strides = [1, 1]} : vector<8x96xf32> to vector<8x8xf32>
    %10 = vector.extract_strided_slice %6 {offsets = [0, 32], sizes = [8, 8], strides = [1, 1]} : vector<8x96xf32> to vector<8x8xf32>
    %11 = vector.extract_strided_slice %6 {offsets = [0, 64], sizes = [8, 8], strides = [1, 1]} : vector<8x96xf32> to vector<8x8xf32>
    %cst_9 = arith.constant dense<0.000000e+00> : vector<8x8xf32>
    %12 = tpu.matmul %9, %10, %cst_9 {dimension_numbers = #tpu.dot_dimension_numbers<[1], [1], [0], [0], [0, 0, 1, 0], [], []>} : vector<8x8xf32>, vector<8x8xf32>, vector<8x8xf32> -> vector<8x8xf32>
    %cst_10 = arith.constant dense<0xFF800000> : vector<8xf32>
    %13 = vector.multi_reduction <maximumf>, %12, %cst_10 [1] : vector<8x8xf32> to vector<8xf32>
    %14 = vector.shape_cast %13 : vector<8xf32> to vector<8x1xf32>
    %15 = vector.broadcast %14 : vector<8x1xf32> to vector<8x8xf32>
    %16 = arith.subf %12, %15 : vector<8x8xf32>
    %17 = math.exp %16 : vector<8x8xf32>
    %cst_11 = arith.constant dense<0.000000e+00> : vector<8xf32>
    %18 = vector.multi_reduction <add>, %17, %cst_11 [1] : vector<8x8xf32> to vector<8xf32>
    %19 = vector.shape_cast %18 : vector<8xf32> to vector<8x1xf32>
    %cst_12 = arith.constant dense<0.000000e+00> : vector<8x8xf32>
    %20 = tpu.matmul %17, %11, %cst_12 {dimension_numbers = #tpu.dot_dimension_numbers<[1], [0], [0], [1], [0, 0, 1, 1], [], []>} : vector<8x8xf32>, vector<8x8xf32>, vector<8x8xf32> -> vector<8x8xf32>
    %21 = tpu.reciprocal %19 {approx = true} : vector<8x1xf32> -> vector<8x1xf32>
    %22 = vector.broadcast %21 : vector<8x1xf32> to vector<8x8xf32>
    %23 = arith.mulf %20, %22 : vector<8x8xf32>
    %24 = vector.extract_strided_slice %8 {offsets = [0, 0], sizes = [8, 32], strides = [1, 1]} : vector<32x32xf32> to vector<8x32xf32>
    %cst_13 = arith.constant dense<0.000000e+00> : vector<8x32xf32>
    %25 = tpu.matmul %23, %24, %cst_13 {dimension_numbers = #tpu.dot_dimension_numbers<[1], [0], [0], [1], [0, 0, 1, 1], [], []>} : vector<8x8xf32>, vector<8x32xf32>, vector<8x32xf32> -> vector<8x32xf32>
    %26 = arith.addf %7, %25 : vector<8x32xf32>
    %27 = vector.extract_strided_slice %6 {offsets = [0, 8], sizes = [8, 8], strides = [1, 1]} : vector<8x96xf32> to vector<8x8xf32>
    %28 = vector.extract_strided_slice %6 {offsets = [0, 40], sizes = [8, 8], strides = [1, 1]} : vector<8x96xf32> to vector<8x8xf32>
    %29 = vector.extract_strided_slice %6 {offsets = [0, 72], sizes = [8, 8], strides = [1, 1]} : vector<8x96xf32> to vector<8x8xf32>
    %cst_14 = arith.constant dense<0.000000e+00> : vector<8x8xf32>
    %30 = tpu.matmul %27, %28, %cst_14 {dimension_numbers = #tpu.dot_dimension_numbers<[1], [1], [0], [0], [0, 0, 1, 0], [], []>} : vector<8x8xf32>, vector<8x8xf32>, vector<8x8xf32> -> vector<8x8xf32>
    %cst_15 = arith.constant dense<0xFF800000> : vector<8xf32>
    %31 = vector.multi_reduction <maximumf>, %30, %cst_15 [1] : vector<8x8xf32> to vector<8xf32>
    %32 = vector.shape_cast %31 : vector<8xf32> to vector<8x1xf32>
    %33 = vector.broadcast %32 : vector<8x1xf32> to vector<8x8xf32>
    %34 = arith.subf %30, %33 : vector<8x8xf32>
    %35 = math.exp %34 : vector<8x8xf32>
    %cst_16 = arith.constant dense<0.000000e+00> : vector<8xf32>
    %36 = vector.multi_reduction <add>, %35, %cst_16 [1] : vector<8x8xf32> to vector<8xf32>
    %37 = vector.shape_cast %36 : vector<8xf32> to vector<8x1xf32>
    %cst_17 = arith.constant dense<0.000000e+00> : vector<8x8xf32>
    %38 = tpu.matmul %35, %29, %cst_17 {dimension_numbers = #tpu.dot_dimension_numbers<[1], [0], [0], [1], [0, 0, 1, 1], [], []>} : vector<8x8xf32>, vector<8x8xf32>, vector<8x8xf32> -> vector<8x8xf32>
    %39 = tpu.reciprocal %37 {approx = true} : vector<8x1xf32> -> vector<8x1xf32>
    %40 = vector.broadcast %39 : vector<8x1xf32> to vector<8x8xf32>
    %41 = arith.mulf %38, %40 : vector<8x8xf32>
    %42 = vector.extract_strided_slice %8 {offsets = [8, 0], sizes = [8, 32], strides = [1, 1]} : vector<32x32xf32> to vector<8x32xf32>
    %cst_18 = arith.constant dense<0.000000e+00> : vector<8x32xf32>
    %43 = tpu.matmul %41, %42, %cst_18 {dimension_numbers = #tpu.dot_dimension_numbers<[1], [0], [0], [1], [0, 0, 1, 1], [], []>} : vector<8x8xf32>, vector<8x32xf32>, vector<8x32xf32> -> vector<8x32xf32>
    %44 = arith.addf %26, %43 : vector<8x32xf32>
    %45 = vector.extract_strided_slice %6 {offsets = [0, 16], sizes = [8, 8], strides = [1, 1]} : vector<8x96xf32> to vector<8x8xf32>
    %46 = vector.extract_strided_slice %6 {offsets = [0, 48], sizes = [8, 8], strides = [1, 1]} : vector<8x96xf32> to vector<8x8xf32>
    %47 = vector.extract_strided_slice %6 {offsets = [0, 80], sizes = [8, 8], strides = [1, 1]} : vector<8x96xf32> to vector<8x8xf32>
    %cst_19 = arith.constant dense<0.000000e+00> : vector<8x8xf32>
    %48 = tpu.matmul %45, %46, %cst_19 {dimension_numbers = #tpu.dot_dimension_numbers<[1], [1], [0], [0], [0, 0, 1, 0], [], []>} : vector<8x8xf32>, vector<8x8xf32>, vector<8x8xf32> -> vector<8x8xf32>
    %cst_20 = arith.constant dense<0xFF800000> : vector<8xf32>
    %49 = vector.multi_reduction <maximumf>, %48, %cst_20 [1] : vector<8x8xf32> to vector<8xf32>
    %50 = vector.shape_cast %49 : vector<8xf32> to vector<8x1xf32>
    %51 = vector.broadcast %50 : vector<8x1xf32> to vector<8x8xf32>
    %52 = arith.subf %48, %51 : vector<8x8xf32>
    %53 = math.exp %52 : vector<8x8xf32>
    %cst_21 = arith.constant dense<0.000000e+00> : vector<8xf32>
    %54 = vector.multi_reduction <add>, %53, %cst_21 [1] : vector<8x8xf32> to vector<8xf32>
    %55 = vector.shape_cast %54 : vector<8xf32> to vector<8x1xf32>
    %cst_22 = arith.constant dense<0.000000e+00> : vector<8x8xf32>
    %56 = tpu.matmul %53, %47, %cst_22 {dimension_numbers = #tpu.dot_dimension_numbers<[1], [0], [0], [1], [0, 0, 1, 1], [], []>} : vector<8x8xf32>, vector<8x8xf32>, vector<8x8xf32> -> vector<8x8xf32>
    %57 = tpu.reciprocal %55 {approx = true} : vector<8x1xf32> -> vector<8x1xf32>
    %58 = vector.broadcast %57 : vector<8x1xf32> to vector<8x8xf32>
    %59 = arith.mulf %56, %58 : vector<8x8xf32>
    %60 = vector.extract_strided_slice %8 {offsets = [16, 0], sizes = [8, 32], strides = [1, 1]} : vector<32x32xf32> to vector<8x32xf32>
    %cst_23 = arith.constant dense<0.000000e+00> : vector<8x32xf32>
    %61 = tpu.matmul %59, %60, %cst_23 {dimension_numbers = #tpu.dot_dimension_numbers<[1], [0], [0], [1], [0, 0, 1, 1], [], []>} : vector<8x8xf32>, vector<8x32xf32>, vector<8x32xf32> -> vector<8x32xf32>
    %62 = arith.addf %44, %61 : vector<8x32xf32>
    %63 = vector.extract_strided_slice %6 {offsets = [0, 24], sizes = [8, 8], strides = [1, 1]} : vector<8x96xf32> to vector<8x8xf32>
    %64 = vector.extract_strided_slice %6 {offsets = [0, 56], sizes = [8, 8], strides = [1, 1]} : vector<8x96xf32> to vector<8x8xf32>
    %65 = vector.extract_strided_slice %6 {offsets = [0, 88], sizes = [8, 8], strides = [1, 1]} : vector<8x96xf32> to vector<8x8xf32>
    %cst_24 = arith.constant dense<0.000000e+00> : vector<8x8xf32>
    %66 = tpu.matmul %63, %64, %cst_24 {dimension_numbers = #tpu.dot_dimension_numbers<[1], [1], [0], [0], [0, 0, 1, 0], [], []>} : vector<8x8xf32>, vector<8x8xf32>, vector<8x8xf32> -> vector<8x8xf32>
    %cst_25 = arith.constant dense<0xFF800000> : vector<8xf32>
    %67 = vector.multi_reduction <maximumf>, %66, %cst_25 [1] : vector<8x8xf32> to vector<8xf32>
    %68 = vector.shape_cast %67 : vector<8xf32> to vector<8x1xf32>
    %69 = vector.broadcast %68 : vector<8x1xf32> to vector<8x8xf32>
    %70 = arith.subf %66, %69 : vector<8x8xf32>
    %71 = math.exp %70 : vector<8x8xf32>
    %cst_26 = arith.constant dense<0.000000e+00> : vector<8xf32>
    %72 = vector.multi_reduction <add>, %71, %cst_26 [1] : vector<8x8xf32> to vector<8xf32>
    %73 = vector.shape_cast %72 : vector<8xf32> to vector<8x1xf32>
    %cst_27 = arith.constant dense<0.000000e+00> : vector<8x8xf32>
    %74 = tpu.matmul %71, %65, %cst_27 {dimension_numbers = #tpu.dot_dimension_numbers<[1], [0], [0], [1], [0, 0, 1, 1], [], []>} : vector<8x8xf32>, vector<8x8xf32>, vector<8x8xf32> -> vector<8x8xf32>
    %75 = tpu.reciprocal %73 {approx = true} : vector<8x1xf32> -> vector<8x1xf32>
    %76 = vector.broadcast %75 : vector<8x1xf32> to vector<8x8xf32>
    %77 = arith.mulf %74, %76 : vector<8x8xf32>
    %78 = vector.extract_strided_slice %8 {offsets = [24, 0], sizes = [8, 32], strides = [1, 1]} : vector<32x32xf32> to vector<8x32xf32>
    %cst_28 = arith.constant dense<0.000000e+00> : vector<8x32xf32>
    %79 = tpu.matmul %77, %78, %cst_28 {dimension_numbers = #tpu.dot_dimension_numbers<[1], [0], [0], [1], [0, 0, 1, 1], [], []>} : vector<8x8xf32>, vector<8x32xf32>, vector<8x32xf32> -> vector<8x32xf32>
    %80 = arith.addf %62, %79 : vector<8x32xf32>
    %c0_29 = arith.constant 0 : index
    %c0_30 = arith.constant 0 : index
    %81 = vector.load %arg5[%c0_29, %c0_30] : memref<1x32xf32, #tpu.memory_space<vmem>>, vector<1x32xf32>
    %82 = vector.broadcast %81 : vector<1x32xf32> to vector<8x32xf32>
    %83 = arith.addf %80, %82 : vector<8x32xf32>
    %c0_31 = arith.constant 0 : index
    %c0_32 = arith.constant 0 : index
    %c0_33 = arith.constant 0 : index
    %84 = vector.load %arg6[%c0_31, %c0_32, %c0_33] : memref<1x8x32xf32, #tpu.memory_space<vmem>>, vector<1x8x32xf32>
    %85 = vector.shape_cast %84 : vector<1x8x32xf32> to vector<8x32xf32>
    %86 = vector.shape_cast %83 : vector<8x32xf32> to vector<1x8x32xf32>
    tpu.vector_store %arg6[%c0_31, %c0_32, %c0_33], %86 {strides = array<i32>} : memref<1x8x32xf32, #tpu.memory_space<vmem>>, vector<1x8x32xf32>,
    return
  }
  func.func @transform_0(%arg0: i32) -> (i32, i32, i32) {
    %c0_i32 = arith.constant 0 : i32
    %c0_i32_0 = arith.constant 0 : i32
    %c0_i32_1 = arith.constant 0 : i32
    return %arg0, %c0_i32, %c0_i32_0 : i32, i32, i32
  }
  func.func @transform_1(%arg0: i32) -> (i32, i32) {
    %c0_i32 = arith.constant 0 : i32
    %c0_i32_0 = arith.constant 0 : i32
    %c0_i32_1 = arith.constant 0 : i32
    return %c0_i32, %c0_i32_0 : i32, i32
  }
  func.func @transform_2(%arg0: i32) -> (i32, i32) {
    %c0_i32 = arith.constant 0 : i32
    %c0_i32_0 = arith.constant 0 : i32
    %c0_i32_1 = arith.constant 0 : i32
    return %c0_i32, %c0_i32_0 : i32, i32
  }
  func.func @transform_3(%arg0: i32) -> (i32, i32) {
    %c0_i32 = arith.constant 0 : i32
    %c0_i32_0 = arith.constant 0 : i32
    %c0_i32_1 = arith.constant 0 : i32
    return %c0_i32, %c0_i32_0 : i32, i32
  }
  func.func @transform_4(%arg0: i32) -> (i32, i32) {
    %c0_i32 = arith.constant 0 : i32
    %c0_i32_0 = arith.constant 0 : i32
    %c0_i32_1 = arith.constant 0 : i32
    return %c0_i32, %c0_i32_0 : i32, i32
  }
  func.func @transform_5(%arg0: i32) -> (i32, i32, i32) {
    %c0_i32 = arith.constant 0 : i32
    %c0_i32_0 = arith.constant 0 : i32
    %c0_i32_1 = arith.constant 0 : i32
    return %arg0, %c0_i32, %c0_i32_0 : i32, i32, i32
  }
}

</mosaic_0001>

<bundles_post_ra>
// kernel: tpu_custom_call.1
= control target key start
LH: loop header
LB: loop body
LE: loop exit
PB: predicated region body
PF: predicated region fallthrough
CT: control target
= control target key end

     0   :  { %10 = vsyncpa [#allocation3], 0  ;;  %s2153_s0 = inlined_call_operand.hbm [shape: f32[2,8,32], index: 0, kind: input, shape index: {}]   ;;  %s2154_s1 = inlined_call_operand.hbm [shape: f32[32,96], index: 1, kind: input, shape index: {}]   ;;  %s2155_s2 = inlined_call_operand.hbm [shape: f32[1,96], index: 2, kind: input, shape index: {}]   ;;  %s2156_s3 = inlined_call_operand.hbm [shape: f32[32,32], index: 3, kind: input, shape index: {}]   ;;  %s2157_s4 = inlined_call_operand.hbm [shape: f32[1,32], index: 4, kind: input, shape index: {}]   ;;  %s2158_s5 = inlined_call_operand.hbm [shape: f32[2,8,32], index: 5, kind: output, shape index: {}]  }
   0x1   :  { %12 = vsyncpa [#allocation3 + $0x1], 0 }
   0x2   :  { %13 = vsyncpa [#allocation6], 0 }
   0x3   :  { %14 = vsyncpa [#allocation9], 0 }
   0x4   :  { %15 = vsyncpa [#allocation4], 0 }
   0x5   :  { %17 = vsyncpa [#allocation4 + $0x1], 0  ;;  %s1795_s18 = smov 0   ;;  %s1797_s19 = smov 0  }
   0x6   :  { %s1799_s20 = smov 0   ;;  %s1801_s21 = smov 0  }
   0x7 LB: > { %s1740_s22 = smov [#allocation5]   ;;  %s1816_s24 = sadd.s32 4294967295, %s1738_s21   ;;  %s1738_s21 = sphi %s1801_s21, %s2182_s21   ;;  %s1734_s20 = sphi %s1799_s20, %s2181_s20   ;;  %s1730_s19 = sphi %s1797_s19, %s2180_s19   ;;  %s1726_s18 = sphi %s1795_s18, %s2179_s18  }
   0x8   : > { %s176_s23 = sshll.u32 %s1740_s22, 4  ;;  %p1265_p0 = scmp.ge.s32.totalorder %s1738_s21, 1  ;;  %s1821_s23 = int_to_ptr.vmem [resolvable:$true] %s176_s23 }
   0x9   : > { %p2159_p1 = scmp.eq.s32.totalorder %s1816_s24, 0  ;;  %p164_p2 = scmp.lt.s32.totalorder %s1738_s21, 3 }
   0xa   : > { %s1741_s26 = smov [#allocation8]   ;;  %s1742_s29 = smov [#allocation7]  }
   0xb   : > { %p1823_p3 = pnand %p1265_p0, %p164_p2  ;;  %s200_s27 = sshll.u32 %s1741_s26, 4  ;;  %s1836_s27 = int_to_ptr.vmem [resolvable:$true] %s200_s27 }
   0xc   : > { %s190_s30 = sshll.u32 %s1742_s29, 4  ;;  %s1522_s8 = scalar_lea.hbm %s2154_s1, 512  ;;  %s1838_s30 = int_to_ptr.vmem [resolvable:$true] %s190_s30 }
   0xd   : > { %s2162_s25 = scalar_select %p1823_p3, 1, 0 }
   0xe   : > { %p1420_p5 = pneg %p1823_p3  ;;  %p1523_p7 = scmp.ne.s32.totalorder %s2154_s1, %s1522_s8 }
   0xf   : > { %p1529_p11 = scmp.lt.u32.totalorder %s1522_s8, %s2154_s1 }
  0x10   : > { %p1832_p6 = pnand %p1420_p5, %p2159_p1 }
  0x12   : > { %p1848_p8 = pneg %p1832_p6 }
  0x14   : > { %p1525_p9 = pnand %p1848_p8, %p1523_p7 }
  0x16   : > { %p1526_p10 = pneg %p1525_p9 }
  0x18   : > { %p1531_p12 = pnand %p1529_p11, %p1526_p10 }
  0x1a   : > { %1534 = shalt.err (!%p1531_p12)
}
  0x1b   : > { %s1535_s14 = scalar_lea.vmem %s1821_s23, 512  ;;  %p1543_p5 = scmp.lt.s32.totalorder %s1821_s23, %s1821_s23 }
  0x1c   : > { %p1536_p13 = scmp.ne.s32.totalorder %s1821_s23, %s1535_s14  ;;  %p1544_p4 = scmp.lt.s32.totalorder %s1535_s14, %s1535_s14 }
  0x1e   : > { %p1538_p0 = pnand %p1536_p13, %p1848_p8  ;;  %p1545_p7 = por %p1544_p4, %p1543_p5 }
  0x20   : > { %p1539_p2 = pneg %p1538_p0 }
  0x22   : > { %p1546_p9 = pnand %p1545_p7, %p1539_p2 }
  0x24   : > { %1549 = shalt.err (!%p1546_p9)
}
  0x25   : > { %s1743_s15 = smov 128   ;;  %s1744_s16 = smov 8  }
  0x26   : > { %1423 = dma.hbm_to_vmem [thread:$0]  (!%p1832_p6), %s2154_s1, 512, %s1821_s23, [#allocation6], %s1743_s15, %s1743_s15, %s1744_s16  }
  0x27   : > { %s1550_s6 = scalar_lea.hbm %s2156_s3, 512 }
  0x28   : > { %p1551_p4 = scmp.ne.s32.totalorder %s2156_s3, %s1550_s6  ;;  %p1557_p12 = scmp.lt.u32.totalorder %s1550_s6, %s2156_s3 }
  0x2a   : > { %p1553_p10 = pnand %p1551_p4, %p1848_p8 }
  0x2c   : > { %p1554_p11 = pneg %p1553_p10 }
  0x2e   : > { %p1559_p13 = pnand %p1557_p12, %p1554_p11 }
  0x30   : > { %1562 = shalt.err (!%p1559_p13)
}
  0x31   : > { %s1563_s23 = scalar_lea.vmem %s1836_s27, 512  ;;  %p1571_p7 = scmp.lt.s32.totalorder %s1836_s27, %s1836_s27 }
  0x32   : > { %p1564_p0 = scmp.ne.s32.totalorder %s1836_s27, %s1563_s23  ;;  %p1572_p9 = scmp.lt.s32.totalorder %s1563_s23, %s1563_s23 }
  0x34   : > { %p1566_p2 = pnand %p1564_p0, %p1848_p8  ;;  %p1573_p4 = por %p1572_p9, %p1571_p7 }
  0x36   : > { %p1567_p5 = pneg %p1566_p2 }
  0x38   : > { %p1574_p10 = pnand %p1573_p4, %p1567_p5 }
  0x3a   : > { %1577 = shalt.err (!%p1574_p10)
}
  0x3b   : > { %1429 = dma.hbm_to_vmem [thread:$0]  (!%p1832_p6), %s2156_s3, 512, %s1836_s27, [#allocation9], %s1743_s15, %s1743_s15, %s1744_s16  }
  0x3c   : > { %s1578_s22 = scalar_lea.hbm %s2155_s2, 16 }
  0x3d   : > { %p1579_p11 = scmp.ne.s32.totalorder %s2155_s2, %s1578_s22  ;;  %p1585_p0 = scmp.lt.u32.totalorder %s1578_s22, %s2155_s2 }
  0x3f   : > { %p1581_p12 = pnand %p1579_p11, %p1848_p8 }
  0x41   : > { %p1582_p13 = pneg %p1581_p12 }
  0x43   : > { %p1587_p2 = pnand %p1585_p0, %p1582_p13 }
  0x45   : > { %1590 = shalt.err (!%p1587_p2)
}
  0x46   : > { %s1591_s27 = scalar_lea.vmem %s1838_s30, 16  ;;  %s1598_s15 = scalar_lea.vmem %s1838_s30, 32 }
  0x47   : > { %p1592_p5 = scmp.ne.s32.totalorder %s1838_s30, %s1591_s27  ;;  %p1599_p4 = scmp.lt.s32.totalorder %s1838_s30, %s1838_s30 }
  0x48   : > { %p1600_p10 = scmp.lt.s32.totalorder %s1598_s15, %s1591_s27 }
  0x49   : > { %p1594_p7 = pnand %p1592_p5, %p1848_p8 }
  0x4a   : > { %p1601_p11 = por %p1600_p10, %p1599_p4 }
  0x4b   : > { %p1595_p9 = pneg %p1594_p7 }
  0x4d   : > { %p1602_p12 = pnand %p1601_p11, %p1595_p9 }
  0x4f   : > { %1605 = shalt.err (!%p1602_p12)
}
  0x50   : > { %1426 = dma.hbm_to_vmem [thread:$0]  (!%p1832_p6), %s2155_s2, 16, %s1838_s30, [#allocation6]  }
  0x51   : > { %s1745_s9 = smov [#allocation10]   ;;  %s1606_s13 = scalar_lea.hbm %s2157_s4, 16 }
  0x52   : > { %s214_s10 = sshll.u32 %s1745_s9, 4  ;;  %p1607_p13 = scmp.ne.s32.totalorder %s2157_s4, %s1606_s13  ;;  %s215_s10 = int_to_ptr.vmem [resolvable:$true] %s214_s10 }
  0x53   : > { %p1613_p5 = scmp.lt.u32.totalorder %s1606_s13, %s2157_s4 }
  0x54   : > { %p1609_p0 = pnand %p1607_p13, %p1848_p8 }
  0x56   : > { %p1610_p2 = pneg %p1609_p0 }
  0x58   : > { %p1615_p7 = pnand %p1613_p5, %p1610_p2 }
  0x5a   : > { %1618 = shalt.err (!%p1615_p7)
}
  0x5b   : > { %s1619_s30 = scalar_lea.vmem %s215_s10, 16  ;;  %s1626_s29 = scalar_lea.vmem %s215_s10, 32 }
  0x5c   : > { %p1620_p9 = scmp.ne.s32.totalorder %s215_s10, %s1619_s30  ;;  %p1627_p11 = scmp.lt.s32.totalorder %s215_s10, %s215_s10 }
  0x5d   : > { %p1628_p12 = scmp.lt.s32.totalorder %s1626_s29, %s1619_s30 }
  0x5e   : > { %p1622_p4 = pnand %p1620_p9, %p1848_p8 }
  0x5f   : > { %p1629_p1 = por %p1628_p12, %p1627_p11 }
  0x60   : > { %p1623_p10 = pneg %p1622_p4 }
  0x62   : > { %p1630_p3 = pnand %p1629_p1, %p1623_p10 }
  0x64   : > { %1633 = shalt.err (!%p1630_p3)
}
  0x65   : > { %1432 = dma.hbm_to_vmem [thread:$0]  (!%p1832_p6), %s2157_s4, 16, %s215_s10, [#allocation9]  }
  0x66   : > { %s1264_s11 = sadd.s32 4294967294, %s1738_s21   ;;  %s1936_s28 = sadd.s32 1, %s1738_s21  }
  0x67   : > { %s27_s27 = ssub.s32 %s1738_s21, %s1936_s28  ;;  %s30_s15 = sadd.s32 1, %s1734_s20 }
  0x68   : > { %p28_p1 = scmp.eq.s32.totalorder %s27_s27, 0  ;;  %p37_p3 = scmp.ne.s32.totalorder %s1734_s20, %s1730_s19 }
  0x69   : > { %p38_p8 = scmp.eq.s32.totalorder %s1738_s21, 0  ;;  %p43_p13 = scmp.ne.s32.totalorder %s1730_s19, %s1726_s18 }
  0x6a   : > { %s1947_s16 = scalar_select %p28_p1, %s1734_s20, %s30_s15  }
  0x6b   : > { %p1949_p0 = por %p38_p8, %p37_p3  ;;  %p2166_p2 = scmp.eq.s32.totalorder %s1816_s24, 0 }
  0x6c   : > { %p151_p5 = scmp.eq.s32.totalorder %s1816_s24, 1  ;;  %p157_p7 = scmp.eq.s32.totalorder %s1264_s11, 1 }
  0x6d   : > { %p1955_p6 = por %p2166_p2, %p43_p13  ;;  %p1445_p9 = scmp.lt.s32.totalorder %s1738_s21, 2 }
  0x6e   : > { %s225_s10 = sand.u32 1, %s1734_s20   ;;  %p1962_p4 = por %p151_p5, %p37_p3 }
  0x6f   : > { %p1966_p10 = por %p157_p7, %p43_p13  ;;  %s1271_s13 = sshll.u32 %s225_s10, 3 }
  0x70   : > { %s2168_s23 = scalar_select %p1962_p4, 1, 0 }
  0x71   : > { %s2169_s12 = scalar_select %p1966_p10, 1, 0 }
  0x72   : > { %s1272_s14 = sshll.u32 %s1738_s21, 7  ;;  %s229_s30 = scalar_lea.vmem [#allocation2], %s1271_s13 }
  0x73   : > { %s1974_s26 = scalar_lea.hbm %s2153_s0, %s1272_s14  ;;  %s236_s29 = sshll.u32 %s229_s30, 4  ;;  %s1976_s29 = int_to_ptr.vmem [resolvable:$true] %s236_s29 }
  0x74   : > { %p1980_p11 = pnand %p1445_p9, %p1949_p0  ;;  %s226_s7 = scalar_lea.sflag [#allocation3], %s225_s10 }
  0x75   : > { %s1634_s11 = scalar_lea.hbm %s1974_s26, 128  ;;  %s1639_s13 = scalar_lea.hbm %s2153_s0, 256 }
  0x76   : > { %p1635_p12 = scmp.ne.s32.totalorder %s1974_s26, %s1634_s11  ;;  %p1636_p1 = pneg %p1980_p11 }
  0x77   : > { %p1640_p13 = scmp.lt.u32.totalorder %s1974_s26, %s2153_s0  ;;  %p1641_p0 = scmp.lt.u32.totalorder %s1639_s13, %s1634_s11 }
  0x78   : > { %p1637_p3 = pnand %p1636_p1, %p1635_p12  ;;  %p1643_p5 = scmp.lt.u32.totalorder %s1634_s11, %s1974_s26 }
  0x79   : > { %p1642_p2 = por %p1641_p0, %p1640_p13 }
  0x7a   : > { %p1638_p8 = pneg %p1637_p3 }
  0x7b   : > { %p1644_p7 = por %p1643_p5, %p1642_p2 }
  0x7d   : > { %p1645_p9 = pnand %p1644_p7, %p1638_p8 }
  0x7f   : > { %1648 = shalt.err (!%p1645_p9)
}
  0x80   : > { %s1649_s10 = scalar_lea.vmem %s1976_s29, 128  ;;  %s1746_s17 = smov [#allocation2]  }
  0x81   : > { %p1650_p12 = scmp.ne.s32.totalorder %s1976_s29, %s1649_s10  ;;  %s1654_s22 = sshll.u32 %s1746_s17, 4  ;;  %s1655_s22 = int_to_ptr.vmem [resolvable:$false] %s1654_s22 }
  0x82   : > { %s1656_s30 = scalar_lea.vmem %s1655_s22, 256  ;;  %p1657_p4 = scmp.lt.s32.totalorder %s1976_s29, %s1655_s22 }
  0x83   : > { %p1652_p3 = pnand %p1650_p12, %p1636_p1  ;;  %p1658_p13 = scmp.lt.s32.totalorder %s1656_s30, %s1649_s10 }
  0x85   : > { %p1653_p10 = pneg %p1652_p3  ;;  %p1659_p0 = por %p1658_p13, %p1657_p4 }
  0x87   : > { %p1660_p2 = pnand %p1659_p0, %p1653_p10 }
  0x89   : > { %1663 = shalt.err (!%p1660_p2)
}
  0x8a   : > { %1436 = dma.hbm_to_vmem [thread:$0]  (!%p1980_p11), %s1974_s26, 128, %s1976_s29, %s226_s7  }
  0x8b   : > { %p2171_p8 = scmp.ne.s32.totalorder %s2162_s25, 0 }
  0x8c   : > { %s2012_s11 = sand.u32 (!%p2171_p8), 1, %s1730_s19  }
  0x8d   : > { %245 = sbr.rel (%p2171_p8) target bundleno = 1807 (0x70f), region = 40  ;;  %s1274_s27 = sshll.u32 (!%p2171_p8), %s2012_s11, 3 }
  0x8e   : > { %s248_s15 = scalar_lea.sflag (!%p2171_p8), [#allocation3], %s2012_s11  ;;  %s251_s13 = scalar_lea.vmem (!%p2171_p8), [#allocation2], %s1274_s27 }
  0x94   : > { %1709 = dma.done.wait (%p1955_p6), %s248_s15, 128  }
  0x95   : > { %1711 = vsyncadd (%p1955_p6), %s248_s15, 4294967168  ;;  %p2172_p4 = scmp.eq.s32.totalorder %s1816_s24, 0 }
  0x97   : > { %1713 = dma.done.wait (%p2172_p4), [#allocation6], 528   ;;  %p2173_p10 = pmov %p2172_p4 }
  0x98   : > { %p2174_p11 = pmov %p2172_p4 }
  0x99   : > { %1715 = vsyncadd (%p2173_p10), [#allocation6], 4294966768 }
  0x9a   : > { %1717 = dma.done.wait (%p2174_p11), [#allocation9], 528   ;;  %p2175_p1 = pmov %p2172_p4 }
  0x9b   : > { %v1747_v0 = vmov 0.0|0.0   ;;  %vm1748_vm0 = vmmov 0   ;;  %v1749_v1 = vmov 0.0   ;;  %v295_v2 = vld [vmem:[#allocation5] sm:$0xff]  ;;  %v296_v3 = vld [vmem:[#allocation5 + $0x8] sm:$0xff]  ;;  %v297_v4 = vld [vmem:[#allocation5 + $0x10] sm:$0xff] }
  0x9c   : > { %1719 = vsyncadd (%p2175_p1), [#allocation9], 4294966768  ;;  %1388 = vmatprep.subr.bf16.mxu0 %v1747_v0  ;;  %1334 = vmatprep.mubr.msk.f32.mxu0 %vm1748_vm0, %v1749_v1  ;;  %v1389_v5 = vpack.c.bf16 %v296_v3, %v295_v2  ;;  %v298_v6 = vld [vmem:[#allocation5 + $0x18] sm:$0xff]  ;;  %vm306_vm1 = vcmask 261120   ;;  %v1280_v9 = vld [vmem:[#allocation7] ss:$0 sm:$0xff] }
  0x9d   : > { %1337 = vmatprep.subr.mxu1 %v1749_v1  ;;  %1339 = vmatprep.mubr.msk.f32.mxu1 %vm1748_vm0, %v1749_v1  ;;  %v1392_v7 = vpack.c.bf16 %v298_v6, %v297_v4  ;;  %v294_v8 = vld [vmem:[%s251_s13] sm:$0xff]  ;;  %s1750_s25 = smov 64   ;;  %s1751_s9 = smov 96   ;;  %vm383_vm2 = vcmask 64512   ;;  %v1057_v59 = vld [vmem:[#allocation8] sm:$0xff]  ;;  %vm1053_vm3 = vcmask 130048  }
  0x9e   : > { %1390 = vmatpush3.bf16.msra.mxu0 %v1389_v5  ;;  %s1752_s26 = smov 88   ;;  %s1753_s29 = smov 120   ;;  %v1058_v60 = vld [vmem:[#allocation8 + $0x8] sm:$0xff]  ;;  %v1059_v63 = vld [vmem:[#allocation8 + $0x10] sm:$0xff]  ;;  %v1060_v2 = vld [vmem:[#allocation8 + $0x18] sm:$0xff]  ;;  %vm1055_vm4 = vcmask 195584  }
  0x9f   : > { %1391 = vmatprep.subr.bf16.mxu0 %v1747_v0  ;;  %s1754_s6 = smov 80   ;;  %s1755_s7 = smov 112   ;;  %v1395_v62 = vpack.c.bf16 %v1058_v60, %v1057_v59  ;;  %v1398_v4 = vpack.c.bf16 %v1060_v2, %v1059_v63 }
  0xa0   : > { %s1756_s8 = smov 72   ;;  %s1757_s14 = smov 104  }
  0xa1   : > { %s1758_s10 = smov 56   ;;  %s1759_s17 = smov 40  }
  0xa2   : > { %1393 = vmatpush3.bf16.msra.mxu0 %v1392_v7  ;;  %s1760_s22 = smov 48   ;;  %s1761_s30 = smov 8  }
  0xa3   : > { %1357 = vmatprep.subr.mxu0 %v1749_v1  ;;  %s1762_s15 = smov 16   ;;  %s1763_s13 = smov 24  }
  0xa4   : > { %p2176_p5 = scmp.ne.s32.totalorder %s2168_s23, 0 }
  0xa5   : > { %1335 = vmatmul.mubr.msk.f32.vlgmr.msra.gmra.mrb[0].mxu0 %vm306_vm1, %v294_v8 }
  0xa6   : > { %1359 = vmatprep.mubr.msk.f32.mxu0 %vm1748_vm0, %v1749_v1 }
 0x178   : > { %v376_v10 = vpop.f32.mrb[0].mxu0 }
 0x179   : > { %v2041_v11 = vadd.f32 %v1280_v9, %v376_v10  ;;  %v1336_v12 = vpop.f32.mrb[1].mxu0 }
 0x17b   : > { %467 = vrot.lane.b32.xlu1 %v2041_v11, %s1750_s25  ;;  %381 = vrot.lane.b32.xlu0 %v2041_v11, %s1751_s9  ;;  %s1297_s25 = sshll.u32 %s1816_s24, 7  ;;  %s293_s9 = scalar_lea.vmem [#allocation11], %s1274_s27 }
 0x17c   : > { %s1764_s27 = smov [#allocation11]  }
 0x17f   : > { %547 = vrot.lane.b32.xlu1 %v2041_v11, %s1752_s26  ;;  %s1156_s26 = sshll.u32 %s293_s9, 4  ;;  %s2110_s26 = int_to_ptr.vmem [resolvable:$true] %s1156_s26 }
 0x180   : > { %s1664_s24 = scalar_lea.vmem %s2110_s26, 128 }
 0x181   : > { %p1665_p6 = scmp.ne.s32.totalorder %s2110_s26, %s1664_s24 }
 0x183   : > { %545 = vrot.lane.b32.xlu1 %v2041_v11, %s1753_s29  ;;  %p1666_p7 = pnand %p1665_p6, %p2176_p5 }
 0x185   : > { %p1667_p9 = pneg %p1666_p7 }
 0x187   : > { %712 = vrot.lane.b32.xlu1 %v2041_v11, %s1754_s6 }
 0x18b   : > { %710 = vrot.lane.b32.xlu1 %v2041_v11, %s1755_s7  ;;  %s2108_s7 = scalar_lea.hbm %s2158_s5, %s1297_s25 }
 0x18f   : > { %877 = vrot.lane.b32.xlu1 %v2041_v11, %s1756_s8  ;;  %s1143_s8 = scalar_lea.sflag [#allocation4], %s2012_s11 }
 0x193   : > { %875 = vrot.lane.b32.xlu1 %v2041_v11, %s1757_s14  ;;  %s1668_s14 = sshll.u32 %s1764_s27, 4  ;;  %s1669_s14 = int_to_ptr.vmem [resolvable:$false] %s1668_s14 }
 0x194   : > { %p1671_p12 = scmp.lt.s32.totalorder %s2110_s26, %s1669_s14 }
 0x1ed   : > { %v468_v13 = vpop.permute.xlu1 %467  ;;  %v382_v14 = vpop.permute.xlu0 %381 }
 0x1ee   : > { %1338 = vmatpush3.xpose.msk.msra.mxu1 %vm383_vm2, %v382_v14 }
 0x1ef   : > { %1342 = vmatprep.subr.mxu1 %v1749_v1 }
 0x1f1   : > { %v548_v15 = vpop.permute.xlu1 %547  ;;  %1340 = vmatmul.mubr.msk.f32.vlgmr.msra.gmra.mrb[0].mxu1 %vm383_vm2, %v2041_v11 }
 0x1f2   : > { %1343 = vmatpush3.msra.mxu1 %v468_v13  ;;  %1344 = vmatprep.mubr.msk.f32.mxu1 %vm1748_vm0, %v1749_v1 }
 0x1f3   : > { %1347 = vmatprep.subr.mxu1 %v1749_v1 }
 0x1f5   : > { %v546_v16 = vpop.permute.xlu1 %545 }
 0x1f9   : > { %v713_v17 = vpop.permute.xlu1 %712 }
 0x1fa   : > { %1358 = vmatpush3.xpose.msk.msra.mxu0 %vm383_vm2, %v713_v17 }
 0x1fb   : > { %1367 = vmatprep.subr.mxu0 %v1749_v1 }
 0x1fd   : > { %v711_v18 = vpop.permute.xlu1 %710 }
 0x1fe   : > { %1360 = vmatmul.mubr.msk.f32.vlgmr.msra.gmra.mrb[2].mxu0 %vm383_vm2, %v711_v18 }
 0x1ff   : > { %1369 = vmatprep.mubr.msk.f32.mxu0 %vm1748_vm0, %v1749_v1 }
 0x201   : > { %v878_v19 = vpop.permute.xlu1 %877 }
 0x202   : > { %1368 = vmatpush3.xpose.msk.msra.mxu0 %vm383_vm2, %v878_v19 }
 0x203   : > { %1394 = vmatprep.subr.bf16.mxu0 %v1747_v0 }
 0x205   : > { %v876_v20 = vpop.permute.xlu1 %875 }
 0x206   : > { %1370 = vmatmul.mubr.msk.f32.vlgmr.msra.gmra.mrb[4].mxu0 %vm383_vm2, %v876_v20 }
 0x207   : > { %1385 = vmatprep.mubr.msk.f32.mxu0 %vm1748_vm0, %v1749_v1  ;;  %1396 = vmatpush3.bf16.msra.mxu0 %v1395_v62 }
 0x208   : > { %1397 = vmatprep.subr.bf16.mxu0 %v1747_v0 }
 0x20b   : > { %1399 = vmatpush3.bf16.msra.mxu0 %v1398_v4 }
 0x2c4   : > { %v454_v21 = vpop.f32.mrb[0].mxu1 }
 0x2c5   : > { %v1341_v22 = vpop.f32.mrb[1].mxu1  ;;  %v458_v23 = vsel %vm383_vm2, %v454_v21, -inf }
 0x2c6   : > { %459 = vmax.xlane.f32.xlu0 %v458_v23 }
 0x2d1   : > { %v784_v24 = vpop.f32.mrb[2].mxu0 }
 0x2d2   : > { %v1361_v25 = vpop.f32.mrb[3].mxu0  ;;  %v788_v28 = vsel %vm383_vm2, %v784_v24, -inf }
 0x2d9   : > { %v949_v26 = vpop.f32.mrb[4].mxu0 }
 0x2da   : > { %v1371_v27 = vpop.f32.mrb[5].mxu0  ;;  %v953_v29 = vsel %vm383_vm2, %v949_v26, -inf }
 0x2dc   : > { %632 = vrot.lane.b32.xlu0 %v2041_v11, %s1758_s10  ;;  %s1670_s10 = scalar_lea.vmem %s1669_s14, 256 }
 0x2dd   : > { %p1672_p3 = scmp.lt.s32.totalorder %s1670_s10, %s1664_s24 }
 0x2df   : > { %p1673_p13 = por %p1672_p3, %p1671_p12 }
 0x2e1   : > { %p1674_p0 = pnand %p1673_p13, %p1667_p9 }
 0x2fb   : > { %789 = vmax.xlane.f32.xlu0 %v788_v28 }
 0x2ff   : > { %954 = vmax.xlane.f32.xlu0 %v953_v29 }
 0x315   : > { %962 = vrot.lane.b32.xlu0 %v2041_v11, %s1759_s17 }
 0x353   : > { %v460_v30 = vpop.xlane.xlu0 %459 }
 0x354   : > { %v461_v31 = vsub.f32 %v454_v21, %v460_v30 }
 0x356   : > { %v462_v32 = vmul.f32 1.442695, %v461_v31 }
 0x357   : > { %v633_v34 = vpop.permute.xlu0 %632 }
 0x358   : > { %1506 = vpow2.f32 %v462_v32 }
 0x362   : > { %v1507_v33 = vpop.eup %1506 }
 0x363   : > { %1345 = vmatmul.mubr.msk.f32.vlgmr.msra.gmra.mrb[2].mxu1 %vm383_vm2, %v1507_v33  ;;  %v464_v57 = vsel %vm383_vm2, %v1507_v33, 0.0 }
 0x364   : > { %1348 = vmatpush3.xpose.msk.msra.mxu1 %vm383_vm2, %v548_v15  ;;  %1349 = vmatprep.mubr.msk.f32.mxu1 %vm1748_vm0, %v1749_v1 }
 0x365   : > { %1352 = vmatprep.subr.mxu1 %v1749_v1 }
 0x367   : > { %1350 = vmatmul.mubr.msk.f32.vlgmr.msra.gmra.mrb[4].mxu1 %vm383_vm2, %v546_v16 }
 0x368   : > { %1353 = vmatpush3.msra.mxu1 %v633_v34  ;;  %1354 = vmatprep.mubr.msk.f32.mxu1 %vm1748_vm0, %v1749_v1 }
 0x369   : > { %1362 = vmatprep.subr.mxu1 %v1749_v1 }
 0x388   : > { %v790_v40 = vpop.xlane.xlu0 %789 }
 0x389   : > { %v791_v41 = vsub.f32 %v784_v24, %v790_v40  ;;  %v1294_v24 = vld [vmem:[#allocation10] ss:$0 sm:$0xff] }
 0x38b   : > { %v792_v42 = vmul.f32 1.442695, %v791_v41 }
 0x38c   : > { %v955_v45 = vpop.xlane.xlu0 %954 }
 0x38d   : > { %1508 = vpow2.f32 %v792_v42  ;;  %v956_v46 = vsub.f32 %v949_v26, %v955_v45 }
 0x38f   : > { %v957_v49 = vmul.f32 1.442695, %v956_v46 }
 0x390   : > { %v963_v55 = vpop.permute.xlu0 %962 }
 0x397   : > { %v1509_v43 = vpop.eup %1508 }
 0x398   : > { %v794_v44 = vsel %vm383_vm2, %v1509_v43, 0.0 }
 0x436   : > { %v2082_v35 = vpop.f32.mrb[2].mxu1 }
 0x437   : > { %v1346_v36 = vpop.f32.mrb[3].mxu1 }
 0x43a   : > { %v619_v37 = vpop.f32.mrb[4].mxu1 }
 0x43b   : > { %v1351_v38 = vpop.f32.mrb[5].mxu1  ;;  %v623_v39 = vsel %vm383_vm2, %v619_v37, -inf }
 0x43c   : > { %624 = vmax.xlane.f32.xlu1 %v623_v39 }
 0x44d   : > { %797 = vrot.lane.b32.xlu1 %v2041_v11, %s1760_s22 }
 0x471   : > { %795 = vadd.xlane.f32.xlu1 %v794_v44 }
 0x4c9   : > { %v625_v47 = vpop.xlane.xlu1 %624 }
 0x4ca   : > { %v626_v48 = vsub.f32 %v619_v37, %v625_v47 }
 0x4cc   : > { %v627_v50 = vmul.f32 1.442695, %v626_v48 }
 0x4cd   : > { %v798_v52 = vpop.permute.xlu1 %797 }
 0x4ce   : > { %1510 = vpow2.f32 %v627_v50 }
 0x4cf   : > { %1512 = vpow2.f32 %v957_v49 }
 0x4d8   : > { %v1511_v51 = vpop.eup %1510 }
 0x4d9   : > { %1355 = vmatmul.mubr.msk.f32.vlgmr.msra.gmra.mrb[6].mxu1 %vm383_vm2, %v1511_v51  ;;  %v629_v53 = vsel %vm383_vm2, %v1511_v51, 0.0  ;;  %v1513_v54 = vpop.eup %1512 }
 0x4da   : > { %1363 = vmatpush3.msra.mxu1 %v798_v52  ;;  %630 = vadd.xlane.f32.xlu0 %v629_v53  ;;  %v959_v56 = vsel %vm383_vm2, %v1513_v54, 0.0 }
 0x4db   : > { %1364 = vmatprep.mubr.msk.f32.mxu1 %vm1748_vm0, %v1749_v1  ;;  %1372 = vmatprep.subr.mxu1 %v1749_v1 }
 0x4dd   : > { %1365 = vmatmul.mubr.msk.f32.vlgmr.msra.gmra.mrb[8].mxu1 %vm383_vm2, %v1509_v43 }
 0x4de   : > { %1373 = vmatpush3.msra.mxu1 %v963_v55  ;;  %960 = vadd.xlane.f32.xlu0 %v959_v56 }
 0x4df   : > { %1374 = vmatprep.mubr.msk.f32.mxu1 %vm1748_vm0, %v1749_v1 }
 0x4e1   : > { %1375 = vmatmul.mubr.msk.f32.vlgmr.msra.gmra.mrb[10].mxu1 %vm383_vm2, %v1513_v54 }
 0x4e2   : > { %465 = vadd.xlane.f32.xlu0 %v464_v57 }
 0x4fe   : > { %v796_v61 = vpop.xlane.xlu1 %795 }
 0x567   : > { %v631_v58 = vpop.xlane.xlu0 %630 }
 0x568   : > { %1514 = vrcp.f32 %v631_v58 }
 0x569   : > { %1516 = vrcp.f32 %v796_v61 }
 0x56b   : > { %v961_v3 = vpop.xlane.xlu0 %960 }
 0x56c   : > { %1518 = vrcp.f32 %v961_v3 }
 0x56f   : > { %v466_v15 = vpop.xlane.xlu0 %465 }
 0x570   : > { %1520 = vrcp.f32 %v466_v15 }
 0x572   : > { %v1515_v1 = vpop.eup %1514 }
 0x573   : > { %v1517_v8 = vpop.eup %1516 }
 0x576   : > { %v1519_v12 = vpop.eup %1518 }
 0x57a   : > { %v1521_v16 = vpop.eup %1520 }
 0x57b   : > { %v544_v18 = vmul.f32 %v1521_v16, %v2082_v35 }
 0x5ac   : > { %v704_v5 = vpop.f32.mrb[6].mxu1 }
 0x5ad   : > { %v709_v6 = vmul.f32 %v1515_v1, %v704_v5  ;;  %v1356_v7 = vpop.f32.mrb[7].mxu1 }
 0x5af   : > { %1041 = vrot.lane.b32.xlu0 %v709_v6, %s1761_s30 }
 0x5b0   : > { %v869_v9 = vpop.f32.mrb[8].mxu1 }
 0x5b1   : > { %v874_v10 = vmul.f32 %v1517_v8, %v869_v9  ;;  %v1366_v11 = vpop.f32.mrb[9].mxu1 }
 0x5b3   : > { %1045 = vrot.lane.b32.xlu1 %v874_v10, %s1762_s15 }
 0x5b4   : > { %v1034_v0 = vpop.f32.mrb[10].mxu1 }
 0x5b5   : > { %v1039_v13 = vmul.f32 %v1519_v12, %v1034_v0  ;;  %v1376_v14 = vpop.f32.mrb[11].mxu1 }
 0x5b7   : > { %1049 = vrot.lane.b32.xlu0 %v1039_v13, %s1763_s13 }
 0x621   : > { %v1042_v17 = vpop.permute.xlu0 %1041 }
 0x622   : > { %v1052_v20 = vsel %vm383_vm2, %v544_v18, %v1042_v17 }
 0x625   : > { %v1046_v19 = vpop.permute.xlu1 %1045 }
 0x626   : > { %v1054_v21 = vsel %vm1053_vm3, %v1052_v20, %v1046_v19 }
 0x629   : > { %v1050_v22 = vpop.permute.xlu0 %1049 }
 0x62a   : > { %v1056_v23 = vsel %vm1055_vm4, %v1054_v21, %v1050_v22 }
 0x62b   : > { %1386 = vmatmul.mubr.msk.f32.vlgmr.msra.gmra.mrb[6].mxu0 %vm306_vm1, %v1056_v23 }
 0x6fe   : > { %v1137_v25 = vpop.f32.mrb[6].mxu0 }
 0x6ff   : > { %v1138_v26 = vadd.f32 %v1294_v24, %v1137_v25  ;;  %v1387_v27 = vpop.f32.mrb[7].mxu0 }
 0x701   : > { %1141 = vst.msk [vmem:[%s293_s9] sm:$0xff] %vm306_vm1, %v1138_v26 }
 0x702   : > { %1677 = shalt.err (!%p1674_p0)
}
 0x703   : > { %s1678_s11 = scalar_lea.hbm %s2108_s7, 128  ;;  %s1682_s30 = scalar_lea.hbm %s2158_s5, 256 }
 0x704   : > { %p1679_p2 = scmp.ne.s32.totalorder %s2108_s7, %s1678_s11  ;;  %p1683_p10 = scmp.lt.u32.totalorder %s2108_s7, %s2158_s5 }
 0x705   : > { %p1684_p11 = scmp.lt.u32.totalorder %s1682_s30, %s1678_s11  ;;  %p1686_p6 = scmp.lt.u32.totalorder %s1678_s11, %s2108_s7 }
 0x706   : > { %p1680_p8 = pnand %p1679_p2, %p2176_p5 }
 0x707   : > { %p1685_p1 = por %p1684_p11, %p1683_p10 }
 0x708   : > { %p1681_p4 = pneg %p1680_p8 }
 0x709   : > { %p1687_p7 = por %p1686_p6, %p1685_p1 }
 0x70b   : > { %p1688_p9 = pnand %p1687_p7, %p1681_p4 }
 0x70d   : > { %1691 = shalt.err (!%p1688_p9)
}
 0x70e   : > { %1418 = dma.vmem_to_hbm [thread:$0]  (%p2176_p5), %s2110_s26, 128, %s2108_s7, %s1143_s8  }
 0x70f PF: > { %s1168_s25 = sand.u32 1, %s1726_s18   ;;  %p2177_p12 = scmp.ne.s32.totalorder %s2169_s12, 0 }
 0x710   : > { %p2178_p3 = scmp.ge.s32.totalorder %s1738_s21, 2  ;;  %s1169_s9 = scalar_lea.sflag [#allocation4], %s1168_s25 }
 0x712   : > { %p1438_p13 = pnand %p2178_p3, %p2177_p12 }
 0x714   : > { %1721 = dma.done.wait (!%p1438_p13), %s1169_s9, 128  }
 0x715   : > { %1723 = vsyncadd (!%p1438_p13), %s1169_s9, 4294967168  ;;  %p20_p0 = scmp.ge.s32.totalorder %s1936_s28, 4   ;;  %s2179_s18 = smov %s1730_s19 }
 0x716   : > { %s2180_s19 = smov %s1734_s20  ;;  %s2181_s20 = smov %s1947_s16 }
 0x717   : > { %s2182_s21 = smov %s1936_s28  ;;  %22 = sbr.rel (!%p20_p0) target bundleno = 7 (0x7), region = 101 }
 0x71e   :  { %1174 = vsyncpa [#allocation3], 1 }
 0x71f   :  { %1176 = vsyncpa [#allocation3 + $0x1], 1 }
 0x720   :  { %1177 = vsyncpa [#allocation6], 1 }
 0x721   :  { %1178 = vsyncpa [#allocation9], 1 }
 0x722   :  { %1179 = vsyncpa [#allocation4], 1 }
 0x723   :  { %1181 = vsyncpa [#allocation4 + $0x1], 1 }

// kernel: tpu_custom_call.1
= control target key start
LH: loop header
LB: loop body
LE: loop exit
PB: predicated region body
PF: predicated region fallthrough
CT: control target
= control target key end

     0   :  { %10 = vsyncpa [#allocation3], 0  ;;  %s2153_s0 = inlined_call_operand.hbm [shape: f32[2,8,32], index: 0, kind: input, shape index: {}]   ;;  %s2154_s1 = inlined_call_operand.hbm [shape: f32[32,96], index: 1, kind: input, shape index: {}]   ;;  %s2155_s2 = inlined_call_operand.hbm [shape: f32[1,96], index: 2, kind: input, shape index: {}]   ;;  %s2156_s3 = inlined_call_operand.hbm [shape: f32[32,32], index: 3, kind: input, shape index: {}]   ;;  %s2157_s4 = inlined_call_operand.hbm [shape: f32[1,32], index: 4, kind: input, shape index: {}]   ;;  %s2158_s5 = inlined_call_operand.hbm [shape: f32[2,8,32], index: 5, kind: output, shape index: {}]  }
   0x1   :  { %12 = vsyncpa [#allocation3 + $0x1], 0 }
   0x2   :  { %13 = vsyncpa [#allocation6], 0 }
   0x3   :  { %14 = vsyncpa [#allocation9], 0 }
   0x4   :  { %15 = vsyncpa [#allocation4], 0 }
   0x5   :  { %17 = vsyncpa [#allocation4 + $0x1], 0  ;;  %s1795_s18 = smov 0   ;;  %s1797_s19 = smov 0  }
   0x6   :  { %s1799_s20 = smov 0   ;;  %s1801_s21 = smov 0  }
   0x7 LB: > { %s1740_s22 = smov [#allocation5]   ;;  %s1816_s24 = sadd.s32 4294967295, %s1738_s21   ;;  %s1738_s21 = sphi %s1801_s21, %s2182_s21   ;;  %s1734_s20 = sphi %s1799_s20, %s2181_s20   ;;  %s1730_s19 = sphi %s1797_s19, %s2180_s19   ;;  %s1726_s18 = sphi %s1795_s18, %s2179_s18  }
   0x8   : > { %s176_s23 = sshll.u32 %s1740_s22, 4  ;;  %p1265_p0 = scmp.ge.s32.totalorder %s1738_s21, 1  ;;  %s1821_s23 = int_to_ptr.vmem [resolvable:$true] %s176_s23 }
   0x9   : > { %p2159_p1 = scmp.eq.s32.totalorder %s1816_s24, 0  ;;  %p164_p2 = scmp.lt.s32.totalorder %s1738_s21, 3 }
   0xa   : > { %s1741_s26 = smov [#allocation8]   ;;  %s1742_s29 = smov [#allocation7]  }
   0xb   : > { %p1823_p3 = pnand %p1265_p0, %p164_p2  ;;  %s200_s27 = sshll.u32 %s1741_s26, 4  ;;  %s1836_s27 = int_to_ptr.vmem [resolvable:$true] %s200_s27 }
   0xc   : > { %s190_s30 = sshll.u32 %s1742_s29, 4  ;;  %s1522_s8 = scalar_lea.hbm %s2154_s1, 512  ;;  %s1838_s30 = int_to_ptr.vmem [resolvable:$true] %s190_s30 }
   0xd   : > { %s2162_s25 = scalar_select %p1823_p3, 1, 0 }
   0xe   : > { %p1420_p5 = pneg %p1823_p3  ;;  %p1523_p7 = scmp.ne.s32.totalorder %s2154_s1, %s1522_s8 }
   0xf   : > { %p1529_p11 = scmp.lt.u32.totalorder %s1522_s8, %s2154_s1 }
  0x10   : > { %p1832_p6 = pnand %p1420_p5, %p2159_p1 }
  0x12   : > { %p1848_p8 = pneg %p1832_p6 }
  0x14   : > { %p1525_p9 = pnand %p1848_p8, %p1523_p7 }
  0x16   : > { %p1526_p10 = pneg %p1525_p9 }
  0x18   : > { %p1531_p12 = pnand %p1529_p11, %p1526_p10 }
  0x1a   : > { %1534 = shalt.err (!%p1531_p12)
}
  0x1b   : > { %s1535_s14 = scalar_lea.vmem %s1821_s23, 512  ;;  %p1543_p5 = scmp.lt.s32.totalorder %s1821_s23, %s1821_s23 }
  0x1c   : > { %p1536_p13 = scmp.ne.s32.totalorder %s1821_s23, %s1535_s14  ;;  %p1544_p4 = scmp.lt.s32.totalorder %s1535_s14, %s1535_s14 }
  0x1e   : > { %p1538_p0 = pnand %p1536_p13, %p1848_p8  ;;  %p1545_p7 = por %p1544_p4, %p1543_p5 }
  0x20   : > { %p1539_p2 = pneg %p1538_p0 }
  0x22   : > { %p1546_p9 = pnand %p1545_p7, %p1539_p2 }
  0x24   : > { %1549 = shalt.err (!%p1546_p9)
}
  0x25   : > { %s1743_s15 = smov 128   ;;  %s1744_s16 = smov 8  }
  0x26   : > { %1423 = dma.hbm_to_vmem [thread:$0]  (!%p1832_p6), %s2154_s1, 512, %s1821_s23, [#allocation6], %s1743_s15, %s1743_s15, %s1744_s16  }
  0x27   : > { %s1550_s6 = scalar_lea.hbm %s2156_s3, 512 }
  0x28   : > { %p1551_p4 = scmp.ne.s32.totalorder %s2156_s3, %s1550_s6  ;;  %p1557_p12 = scmp.lt.u32.totalorder %s1550_s6, %s2156_s3 }
  0x2a   : > { %p1553_p10 = pnand %p1551_p4, %p1848_p8 }
  0x2c   : > { %p1554_p11 = pneg %p1553_p10 }
  0x2e   : > { %p1559_p13 = pnand %p1557_p12, %p1554_p11 }
  0x30   : > { %1562 = shalt.err (!%p1559_p13)
}
  0x31   : > { %s1563_s23 = scalar_lea.vmem %s1836_s27, 512  ;;  %p1571_p7 = scmp.lt.s32.totalorder %s1836_s27, %s1836_s27 }
  0x32   : > { %p1564_p0 = scmp.ne.s32.totalorder %s1836_s27, %s1563_s23  ;;  %p1572_p9 = scmp.lt.s32.totalorder %s1563_s23, %s1563_s23 }
  0x34   : > { %p1566_p2 = pnand %p1564_p0, %p1848_p8  ;;  %p1573_p4 = por %p1572_p9, %p1571_p7 }
  0x36   : > { %p1567_p5 = pneg %p1566_p2 }
  0x38   : > { %p1574_p10 = pnand %p1573_p4, %p1567_p5 }
  0x3a   : > { %1577 = shalt.err (!%p1574_p10)
}
  0x3b   : > { %1429 = dma.hbm_to_vmem [thread:$0]  (!%p1832_p6), %s2156_s3, 512, %s1836_s27, [#allocation9], %s1743_s15, %s1743_s15, %s1744_s16  }
  0x3c   : > { %s1578_s22 = scalar_lea.hbm %s2155_s2, 16 }
  0x3d   : > { %p1579_p11 = scmp.ne.s32.totalorder %s2155_s2, %s1578_s22  ;;  %p1585_p0 = scmp.lt.u32.totalorder %s1578_s22, %s2155_s2 }
  0x3f   : > { %p1581_p12 = pnand %p1579_p11, %p1848_p8 }
  0x41   : > { %p1582_p13 = pneg %p1581_p12 }
  0x43   : > { %p1587_p2 = pnand %p1585_p0, %p1582_p13 }
  0x45   : > { %1590 = shalt.err (!%p1587_p2)
}
  0x46   : > { %s1591_s27 = scalar_lea.vmem %s1838_s30, 16  ;;  %s1598_s15 = scalar_lea.vmem %s1838_s30, 32 }
  0x47   : > { %p1592_p5 = scmp.ne.s32.totalorder %s1838_s30, %s1591_s27  ;;  %p1599_p4 = scmp.lt.s32.totalorder %s1838_s30, %s1838_s30 }
  0x48   : > { %p1600_p10 = scmp.lt.s32.totalorder %s1598_s15, %s1591_s27 }
  0x49   : > { %p1594_p7 = pnand %p1592_p5, %p1848_p8 }
  0x4a   : > { %p1601_p11 = por %p1600_p10, %p1599_p4 }
  0x4b   : > { %p1595_p9 = pneg %p1594_p7 }
  0x4d   : > { %p1602_p12 = pnand %p1601_p11, %p1595_p9 }
  0x4f   : > { %1605 = shalt.err (!%p1602_p12)
}
  0x50   : > { %1426 = dma.hbm_to_vmem [thread:$0]  (!%p1832_p6), %s2155_s2, 16, %s1838_s30, [#allocation6]  }
  0x51   : > { %s1745_s9 = smov [#allocation10]   ;;  %s1606_s13 = scalar_lea.hbm %s2157_s4, 16 }
  0x52   : > { %s214_s10 = sshll.u32 %s1745_s9, 4  ;;  %p1607_p13 = scmp.ne.s32.totalorder %s2157_s4, %s1606_s13  ;;  %s215_s10 = int_to_ptr.vmem [resolvable:$true] %s214_s10 }
  0x53   : > { %p1613_p5 = scmp.lt.u32.totalorder %s1606_s13, %s2157_s4 }
  0x54   : > { %p1609_p0 = pnand %p1607_p13, %p1848_p8 }
  0x56   : > { %p1610_p2 = pneg %p1609_p0 }
  0x58   : > { %p1615_p7 = pnand %p1613_p5, %p1610_p2 }
  0x5a   : > { %1618 = shalt.err (!%p1615_p7)
}
  0x5b   : > { %s1619_s30 = scalar_lea.vmem %s215_s10, 16  ;;  %s1626_s29 = scalar_lea.vmem %s215_s10, 32 }
  0x5c   : > { %p1620_p9 = scmp.ne.s32.totalorder %s215_s10, %s1619_s30  ;;  %p1627_p11 = scmp.lt.s32.totalorder %s215_s10, %s215_s10 }
  0x5d   : > { %p1628_p12 = scmp.lt.s32.totalorder %s1626_s29, %s1619_s30 }
  0x5e   : > { %p1622_p4 = pnand %p1620_p9, %p1848_p8 }
  0x5f   : > { %p1629_p1 = por %p1628_p12, %p1627_p11 }
  0x60   : > { %p1623_p10 = pneg %p1622_p4 }
  0x62   : > { %p1630_p3 = pnand %p1629_p1, %p1623_p10 }
  0x64   : > { %1633 = shalt.err (!%p1630_p3)
}
  0x65   : > { %1432 = dma.hbm_to_vmem [thread:$0]  (!%p1832_p6), %s2157_s4, 16, %s215_s10, [#allocation9]  }
  0x66   : > { %s1264_s11 = sadd.s32 4294967294, %s1738_s21   ;;  %s1936_s28 = sadd.s32 1, %s1738_s21  }
  0x67   : > { %s27_s27 = ssub.s32 %s1738_s21, %s1936_s28  ;;  %s30_s15 = sadd.s32 1, %s1734_s20 }
  0x68   : > { %p28_p1 = scmp.eq.s32.totalorder %s27_s27, 0  ;;  %p37_p3 = scmp.ne.s32.totalorder %s1734_s20, %s1730_s19 }
  0x69   : > { %p38_p8 = scmp.eq.s32.totalorder %s1738_s21, 0  ;;  %p43_p13 = scmp.ne.s32.totalorder %s1730_s19, %s1726_s18 }
  0x6a   : > { %s1947_s16 = scalar_select %p28_p1, %s1734_s20, %s30_s15  }
  0x6b   : > { %p1949_p0 = por %p38_p8, %p37_p3  ;;  %p2166_p2 = scmp.eq.s32.totalorder %s1816_s24, 0 }
  0x6c   : > { %p151_p5 = scmp.eq.s32.totalorder %s1816_s24, 1  ;;  %p157_p7 = scmp.eq.s32.totalorder %s1264_s11, 1 }
  0x6d   : > { %p1955_p6 = por %p2166_p2, %p43_p13  ;;  %p1445_p9 = scmp.lt.s32.totalorder %s1738_s21, 2 }
  0x6e   : > { %s225_s10 = sand.u32 1, %s1734_s20   ;;  %p1962_p4 = por %p151_p5, %p37_p3 }
  0x6f   : > { %p1966_p10 = por %p157_p7, %p43_p13  ;;  %s1271_s13 = sshll.u32 %s225_s10, 3 }
  0x70   : > { %s2168_s23 = scalar_select %p1962_p4, 1, 0 }
  0x71   : > { %s2169_s12 = scalar_select %p1966_p10, 1, 0 }
  0x72   : > { %s1272_s14 = sshll.u32 %s1738_s21, 7  ;;  %s229_s30 = scalar_lea.vmem [#allocation2], %s1271_s13 }
  0x73   : > { %s1974_s26 = scalar_lea.hbm %s2153_s0, %s1272_s14  ;;  %s236_s29 = sshll.u32 %s229_s30, 4  ;;  %s1976_s29 = int_to_ptr.vmem [resolvable:$true] %s236_s29 }
  0x74   : > { %p1980_p11 = pnand %p1445_p9, %p1949_p0  ;;  %s226_s7 = scalar_lea.sflag [#allocation3], %s225_s10 }
  0x75   : > { %s1634_s11 = scalar_lea.hbm %s1974_s26, 128  ;;  %s1639_s13 = scalar_lea.hbm %s2153_s0, 256 }
  0x76   : > { %p1635_p12 = scmp.ne.s32.totalorder %s1974_s26, %s1634_s11  ;;  %p1636_p1 = pneg %p1980_p11 }
  0x77   : > { %p1640_p13 = scmp.lt.u32.totalorder %s1974_s26, %s2153_s0  ;;  %p1641_p0 = scmp.lt.u32.totalorder %s1639_s13, %s1634_s11 }
  0x78   : > { %p1637_p3 = pnand %p1636_p1, %p1635_p12  ;;  %p1643_p5 = scmp.lt.u32.totalorder %s1634_s11, %s1974_s26 }
  0x79   : > { %p1642_p2 = por %p1641_p0, %p1640_p13 }
  0x7a   : > { %p1638_p8 = pneg %p1637_p3 }
  0x7b   : > { %p1644_p7 = por %p1643_p5, %p1642_p2 }
  0x7d   : > { %p1645_p9 = pnand %p1644_p7, %p1638_p8 }
  0x7f   : > { %1648 = shalt.err (!%p1645_p9)
}
  0x80   : > { %s1649_s10 = scalar_lea.vmem %s1976_s29, 128  ;;  %s1746_s17 = smov [#allocation2]  }
  0x81   : > { %p1650_p12 = scmp.ne.s32.totalorder %s1976_s29, %s1649_s10  ;;  %s1654_s22 = sshll.u32 %s1746_s17, 4  ;;  %s1655_s22 = int_to_ptr.vmem [resolvable:$false] %s1654_s22 }
  0x82   : > { %s1656_s30 = scalar_lea.vmem %s1655_s22, 256  ;;  %p1657_p4 = scmp.lt.s32.totalorder %s1976_s29, %s1655_s22 }
  0x83   : > { %p1652_p3 = pnand %p1650_p12, %p1636_p1  ;;  %p1658_p13 = scmp.lt.s32.totalorder %s1656_s30, %s1649_s10 }
  0x85   : > { %p1653_p10 = pneg %p1652_p3  ;;  %p1659_p0 = por %p1658_p13, %p1657_p4 }
  0x87   : > { %p1660_p2 = pnand %p1659_p0, %p1653_p10 }
  0x89   : > { %1663 = shalt.err (!%p1660_p2)
}
  0x8a   : > { %1436 = dma.hbm_to_vmem [thread:$0]  (!%p1980_p11), %s1974_s26, 128, %s1976_s29, %s226_s7  }
  0x8b   : > { %p2171_p8 = scmp.ne.s32.totalorder %s2162_s25, 0 }
  0x8c   : > { %s2012_s11 = sand.u32 (!%p2171_p8), 1, %s1730_s19  }
  0x8d   : > { %245 = sbr.rel (%p2171_p8) target bundleno = 1807 (0x70f), region = 40  ;;  %s1274_s27 = sshll.u32 (!%p2171_p8), %s2012_s11, 3 }
  0x8e   : > { %s248_s15 = scalar_lea.sflag (!%p2171_p8), [#allocation3], %s2012_s11  ;;  %s251_s13 = scalar_lea.vmem (!%p2171_p8), [#allocation2], %s1274_s27 }
  0x94   : > { %1709 = dma.done.wait (%p1955_p6), %s248_s15, 128  }
  0x95   : > { %1711 = vsyncadd (%p1955_p6), %s248_s15, 4294967168  ;;  %p2172_p4 = scmp.eq.s32.totalorder %s1816_s24, 0 }
  0x97   : > { %1713 = dma.done.wait (%p2172_p4), [#allocation6], 528   ;;  %p2173_p10 = pmov %p2172_p4 }
  0x98   : > { %p2174_p11 = pmov %p2172_p4 }
  0x99   : > { %1715 = vsyncadd (%p2173_p10), [#allocation6], 4294966768 }
  0x9a   : > { %1717 = dma.done.wait (%p2174_p11), [#allocation9], 528   ;;  %p2175_p1 = pmov %p2172_p4 }
  0x9b   : > { %v1747_v0 = vmov 0.0|0.0   ;;  %vm1748_vm0 = vmmov 0   ;;  %v1749_v1 = vmov 0.0   ;;  %v295_v2 = vld [vmem:[#allocation5] sm:$0xff]  ;;  %v296_v3 = vld [vmem:[#allocation5 + $0x8] sm:$0xff]  ;;  %v297_v4 = vld [vmem:[#allocation5 + $0x10] sm:$0xff] }
  0x9c   : > { %1719 = vsyncadd (%p2175_p1), [#allocation9], 4294966768  ;;  %1388 = vmatprep.subr.bf16.mxu0 %v1747_v0  ;;  %1334 = vmatprep.mubr.msk.f32.mxu0 %vm1748_vm0, %v1749_v1  ;;  %v1389_v5 = vpack.c.bf16 %v296_v3, %v295_v2  ;;  %v298_v6 = vld [vmem:[#allocation5 + $0x18] sm:$0xff]  ;;  %vm306_vm1 = vcmask 261120   ;;  %v1280_v9 = vld [vmem:[#allocation7] ss:$0 sm:$0xff] }
  0x9d   : > { %1337 = vmatprep.subr.mxu1 %v1749_v1  ;;  %1339 = vmatprep.mubr.msk.f32.mxu1 %vm1748_vm0, %v1749_v1  ;;  %v1392_v7 = vpack.c.bf16 %v298_v6, %v297_v4  ;;  %v294_v8 = vld [vmem:[%s251_s13] sm:$0xff]  ;;  %s1750_s25 = smov 64   ;;  %s1751_s9 = smov 96   ;;  %vm383_vm2 = vcmask 64512   ;;  %v1057_v59 = vld [vmem:[#allocation8] sm:$0xff]  ;;  %vm1053_vm3 = vcmask 130048  }
  0x9e   : > { %1390 = vmatpush3.bf16.msra.mxu0 %v1389_v5  ;;  %s1752_s26 = smov 88   ;;  %s1753_s29 = smov 120   ;;  %v1058_v60 = vld [vmem:[#allocation8 + $0x8] sm:$0xff]  ;;  %v1059_v63 = vld [vmem:[#allocation8 + $0x10] sm:$0xff]  ;;  %v1060_v2 = vld [vmem:[#allocation8 + $0x18] sm:$0xff]  ;;  %vm1055_vm4 = vcmask 195584  }
  0x9f   : > { %1391 = vmatprep.subr.bf16.mxu0 %v1747_v0  ;;  %s1754_s6 = smov 80   ;;  %s1755_s7 = smov 112   ;;  %v1395_v62 = vpack.c.bf16 %v1058_v60, %v1057_v59  ;;  %v1398_v4 = vpack.c.bf16 %v1060_v2, %v1059_v63 }
  0xa0   : > { %s1756_s8 = smov 72   ;;  %s1757_s14 = smov 104  }
  0xa1   : > { %s1758_s10 = smov 56   ;;  %s1759_s17 = smov 40  }
  0xa2   : > { %1393 = vmatpush3.bf16.msra.mxu0 %v1392_v7  ;;  %s1760_s22 = smov 48   ;;  %s1761_s30 = smov 8  }
  0xa3   : > { %1357 = vmatprep.subr.mxu0 %v1749_v1  ;;  %s1762_s15 = smov 16   ;;  %s1763_s13 = smov 24  }
  0xa4   : > { %p2176_p5 = scmp.ne.s32.totalorder %s2168_s23, 0 }
  0xa5   : > { %1335 = vmatmul.mubr.msk.f32.vlgmr.msra.gmra.mrb[0].mxu0 %vm306_vm1, %v294_v8 }
  0xa6   : > { %1359 = vmatprep.mubr.msk.f32.mxu0 %vm1748_vm0, %v1749_v1 }
 0x178   : > { %v376_v10 = vpop.f32.mrb[0].mxu0 }
 0x179   : > { %v2041_v11 = vadd.f32 %v1280_v9, %v376_v10  ;;  %v1336_v12 = vpop.f32.mrb[1].mxu0 }
 0x17b   : > { %467 = vrot.lane.b32.xlu1 %v2041_v11, %s1750_s25  ;;  %381 = vrot.lane.b32.xlu0 %v2041_v11, %s1751_s9  ;;  %s1297_s25 = sshll.u32 %s1816_s24, 7  ;;  %s293_s9 = scalar_lea.vmem [#allocation11], %s1274_s27 }
 0x17c   : > { %s1764_s27 = smov [#allocation11]  }
 0x17f   : > { %547 = vrot.lane.b32.xlu1 %v2041_v11, %s1752_s26  ;;  %s1156_s26 = sshll.u32 %s293_s9, 4  ;;  %s2110_s26 = int_to_ptr.vmem [resolvable:$true] %s1156_s26 }
 0x180   : > { %s1664_s24 = scalar_lea.vmem %s2110_s26, 128 }
 0x181   : > { %p1665_p6 = scmp.ne.s32.totalorder %s2110_s26, %s1664_s24 }
 0x183   : > { %545 = vrot.lane.b32.xlu1 %v2041_v11, %s1753_s29  ;;  %p1666_p7 = pnand %p1665_p6, %p2176_p5 }
 0x185   : > { %p1667_p9 = pneg %p1666_p7 }
 0x187   : > { %712 = vrot.lane.b32.xlu1 %v2041_v11, %s1754_s6 }
 0x18b   : > { %710 = vrot.lane.b32.xlu1 %v2041_v11, %s1755_s7  ;;  %s2108_s7 = scalar_lea.hbm %s2158_s5, %s1297_s25 }
 0x18f   : > { %877 = vrot.lane.b32.xlu1 %v2041_v11, %s1756_s8  ;;  %s1143_s8 = scalar_lea.sflag [#allocation4], %s2012_s11 }
 0x193   : > { %875 = vrot.lane.b32.xlu1 %v2041_v11, %s1757_s14  ;;  %s1668_s14 = sshll.u32 %s1764_s27, 4  ;;  %s1669_s14 = int_to_ptr.vmem [resolvable:$false] %s1668_s14 }
 0x194   : > { %p1671_p12 = scmp.lt.s32.totalorder %s2110_s26, %s1669_s14 }
 0x1ed   : > { %v468_v13 = vpop.permute.xlu1 %467  ;;  %v382_v14 = vpop.permute.xlu0 %381 }
 0x1ee   : > { %1338 = vmatpush3.xpose.msk.msra.mxu1 %vm383_vm2, %v382_v14 }
 0x1ef   : > { %1342 = vmatprep.subr.mxu1 %v1749_v1 }
 0x1f1   : > { %v548_v15 = vpop.permute.xlu1 %547  ;;  %1340 = vmatmul.mubr.msk.f32.vlgmr.msra.gmra.mrb[0].mxu1 %vm383_vm2, %v2041_v11 }
 0x1f2   : > { %1343 = vmatpush3.msra.mxu1 %v468_v13  ;;  %1344 = vmatprep.mubr.msk.f32.mxu1 %vm1748_vm0, %v1749_v1 }
 0x1f3   : > { %1347 = vmatprep.subr.mxu1 %v1749_v1 }
 0x1f5   : > { %v546_v16 = vpop.permute.xlu1 %545 }
 0x1f9   : > { %v713_v17 = vpop.permute.xlu1 %712 }
 0x1fa   : > { %1358 = vmatpush3.xpose.msk.msra.mxu0 %vm383_vm2, %v713_v17 }
 0x1fb   : > { %1367 = vmatprep.subr.mxu0 %v1749_v1 }
 0x1fd   : > { %v711_v18 = vpop.permute.xlu1 %710 }
 0x1fe   : > { %1360 = vmatmul.mubr.msk.f32.vlgmr.msra.gmra.mrb[2].mxu0 %vm383_vm2, %v711_v18 }
 0x1ff   : > { %1369 = vmatprep.mubr.msk.f32.mxu0 %vm1748_vm0, %v1749_v1 }
 0x201   : > { %v878_v19 = vpop.permute.xlu1 %877 }
 0x202   : > { %1368 = vmatpush3.xpose.msk.msra.mxu0 %vm383_vm2, %v878_v19 }
 0x203   : > { %1394 = vmatprep.subr.bf16.mxu0 %v1747_v0 }
 0x205   : > { %v876_v20 = vpop.permute.xlu1 %875 }
 0x206   : > { %1370 = vmatmul.mubr.msk.f32.vlgmr.msra.gmra.mrb[4].mxu0 %vm383_vm2, %v876_v20 }
 0x207   : > { %1385 = vmatprep.mubr.msk.f32.mxu0 %vm1748_vm0, %v1749_v1  ;;  %1396 = vmatpush3.bf16.msra.mxu0 %v1395_v62 }
 0x208   : > { %1397 = vmatprep.subr.bf16.mxu0 %v1747_v0 }
 0x20b   : > { %1399 = vmatpush3.bf16.msra.mxu0 %v1398_v4 }
 0x2c4   : > { %v454_v21 = vpop.f32.mrb[0].mxu1 }
 0x2c5   : > { %v1341_v22 = vpop.f32.mrb[1].mxu1  ;;  %v458_v23 = vsel %vm383_vm2, %v454_v21, -inf }
 0x2c6   : > { %459 = vmax.xlane.f32.xlu0 %v458_v23 }
 0x2d1   : > { %v784_v24 = vpop.f32.mrb[2].mxu0 }
 0x2d2   : > { %v1361_v25 = vpop.f32.mrb[3].mxu0  ;;  %v788_v28 = vsel %vm383_vm2, %v784_v24, -inf }
 0x2d9   : > { %v949_v26 = vpop.f32.mrb[4].mxu0 }
 0x2da   : > { %v1371_v27 = vpop.f32.mrb[5].mxu0  ;;  %v953_v29 = vsel %vm383_vm2, %v949_v26, -inf }
 0x2dc   : > { %632 = vrot.lane.b32.xlu0 %v2041_v11, %s1758_s10  ;;  %s1670_s10 = scalar_lea.vmem %s1669_s14, 256 }
 0x2dd   : > { %p1672_p3 = scmp.lt.s32.totalorder %s1670_s10, %s1664_s24 }
 0x2df   : > { %p1673_p13 = por %p1672_p3, %p1671_p12 }
 0x2e1   : > { %p1674_p0 = pnand %p1673_p13, %p1667_p9 }
 0x2fb   : > { %789 = vmax.xlane.f32.xlu0 %v788_v28 }
 0x2ff   : > { %954 = vmax.xlane.f32.xlu0 %v953_v29 }
 0x315   : > { %962 = vrot.lane.b32.xlu0 %v2041_v11, %s1759_s17 }
 0x353   : > { %v460_v30 = vpop.xlane.xlu0 %459 }
 0x354   : > { %v461_v31 = vsub.f32 %v454_v21, %v460_v30 }
 0x356   : > { %v462_v32 = vmul.f32 1.442695, %v461_v31 }
 0x357   : > { %v633_v34 = vpop.permute.xlu0 %632 }
 0x358   : > { %1506 = vpow2.f32 %v462_v32 }
 0x362   : > { %v1507_v33 = vpop.eup %1506 }
 0x363   : > { %1345 = vmatmul.mubr.msk.f32.vlgmr.msra.gmra.mrb[2].mxu1 %vm383_vm2, %v1507_v33  ;;  %v464_v57 = vsel %vm383_vm2, %v1507_v33, 0.0 }
 0x364   : > { %1348 = vmatpush3.xpose.msk.msra.mxu1 %vm383_vm2, %v548_v15  ;;  %1349 = vmatprep.mubr.msk.f32.mxu1 %vm1748_vm0, %v1749_v1 }
 0x365   : > { %1352 = vmatprep.subr.mxu1 %v1749_v1 }
 0x367   : > { %1350 = vmatmul.mubr.msk.f32.vlgmr.msra.gmra.mrb[4].mxu1 %vm383_vm2, %v546_v16 }
 0x368   : > { %1353 = vmatpush3.msra.mxu1 %v633_v34  ;;  %1354 = vmatprep.mubr.msk.f32.mxu1 %vm1748_vm0, %v1749_v1 }
 0x369   : > { %1362 = vmatprep.subr.mxu1 %v1749_v1 }
 0x388   : > { %v790_v40 = vpop.xlane.xlu0 %789 }
 0x389   : > { %v791_v41 = vsub.f32 %v784_v24, %v790_v40  ;;  %v1294_v24 = vld [vmem:[#allocation10] ss:$0 sm:$0xff] }
 0x38b   : > { %v792_v42 = vmul.f32 1.442695, %v791_v41 }
 0x38c   : > { %v955_v45 = vpop.xlane.xlu0 %954 }
 0x38d   : > { %1508 = vpow2.f32 %v792_v42  ;;  %v956_v46 = vsub.f32 %v949_v26, %v955_v45 }
 0x38f   : > { %v957_v49 = vmul.f32 1.442695, %v956_v46 }
 0x390   : > { %v963_v55 = vpop.permute.xlu0 %962 }
 0x397   : > { %v1509_v43 = vpop.eup %1508 }
 0x398   : > { %v794_v44 = vsel %vm383_vm2, %v1509_v43, 0.0 }
 0x436   : > { %v2082_v35 = vpop.f32.mrb[2].mxu1 }
 0x437   : > { %v1346_v36 = vpop.f32.mrb[3].mxu1 }
 0x43a   : > { %v619_v37 = vpop.f32.mrb[4].mxu1 }
 0x43b   : > { %v1351_v38 = vpop.f32.mrb[5].mxu1  ;;  %v623_v39 = vsel %vm383_vm2, %v619_v37, -inf }
 0x43c   : > { %624 = vmax.xlane.f32.xlu1 %v623_v39 }
 0x44d   : > { %797 = vrot.lane.b32.xlu1 %v2041_v11, %s1760_s22 }
 0x471   : > { %795 = vadd.xlane.f32.xlu1 %v794_v44 }
 0x4c9   : > { %v625_v47 = vpop.xlane.xlu1 %624 }
 0x4ca   : > { %v626_v48 = vsub.f32 %v619_v37, %v625_v47 }
 0x4cc   : > { %v627_v50 = vmul.f32 1.442695, %v626_v48 }
 0x4cd   : > { %v798_v52 = vpop.permute.xlu1 %797 }
 0x4ce   : > { %1510 = vpow2.f32 %v627_v50 }
 0x4cf   : > { %1512 = vpow2.f32 %v957_v49 }
 0x4d8   : > { %v1511_v51 = vpop.eup %1510 }
 0x4d9   : > { %1355 = vmatmul.mubr.msk.f32.vlgmr.msra.gmra.mrb[6].mxu1 %vm383_vm2, %v1511_v51  ;;  %v629_v53 = vsel %vm383_vm2, %v1511_v51, 0.0  ;;  %v1513_v54 = vpop.eup %1512 }
 0x4da   : > { %1363 = vmatpush3.msra.mxu1 %v798_v52  ;;  %630 = vadd.xlane.f32.xlu0 %v629_v53  ;;  %v959_v56 = vsel %vm383_vm2, %v1513_v54, 0.0 }
 0x4db   : > { %1364 = vmatprep.mubr.msk.f32.mxu1 %vm1748_vm0, %v1749_v1  ;;  %1372 = vmatprep.subr.mxu1 %v1749_v1 }
 0x4dd   : > { %1365 = vmatmul.mubr.msk.f32.vlgmr.msra.gmra.mrb[8].mxu1 %vm383_vm2, %v1509_v43 }
 0x4de   : > { %1373 = vmatpush3.msra.mxu1 %v963_v55  ;;  %960 = vadd.xlane.f32.xlu0 %v959_v56 }
 0x4df   : > { %1374 = vmatprep.mubr.msk.f32.mxu1 %vm1748_vm0, %v1749_v1 }
 0x4e1   : > { %1375 = vmatmul.mubr.msk.f32.vlgmr.msra.gmra.mrb[10].mxu1 %vm383_vm2, %v1513_v54 }
 0x4e2   : > { %465 = vadd.xlane.f32.xlu0 %v464_v57 }
 0x4fe   : > { %v796_v61 = vpop.xlane.xlu1 %795 }
 0x567   : > { %v631_v58 = vpop.xlane.xlu0 %630 }
 0x568   : > { %1514 = vrcp.f32 %v631_v58 }
 0x569   : > { %1516 = vrcp.f32 %v796_v61 }
 0x56b   : > { %v961_v3 = vpop.xlane.xlu0 %960 }
 0x56c   : > { %1518 = vrcp.f32 %v961_v3 }
 0x56f   : > { %v466_v15 = vpop.xlane.xlu0 %465 }
 0x570   : > { %1520 = vrcp.f32 %v466_v15 }
 0x572   : > { %v1515_v1 = vpop.eup %1514 }
 0x573   : > { %v1517_v8 = vpop.eup %1516 }
 0x576   : > { %v1519_v12 = vpop.eup %1518 }
 0x57a   : > { %v1521_v16 = vpop.eup %1520 }
 0x57b   : > { %v544_v18 = vmul.f32 %v1521_v16, %v2082_v35 }
 0x5ac   : > { %v704_v5 = vpop.f32.mrb[6].mxu1 }
 0x5ad   : > { %v709_v6 = vmul.f32 %v1515_v1, %v704_v5  ;;  %v1356_v7 = vpop.f32.mrb[7].mxu1 }
 0x5af   : > { %1041 = vrot.lane.b32.xlu0 %v709_v6, %s1761_s30 }
 0x5b0   : > { %v869_v9 = vpop.f32.mrb[8].mxu1 }
 0x5b1   : > { %v874_v10 = vmul.f32 %v1517_v8, %v869_v9  ;;  %v1366_v11 = vpop.f32.mrb[9].mxu1 }
 0x5b3   : > { %1045 = vrot.lane.b32.xlu1 %v874_v10, %s1762_s15 }
 0x5b4   : > { %v1034_v0 = vpop.f32.mrb[10].mxu1 }
 0x5b5   : > { %v1039_v13 = vmul.f32 %v1519_v12, %v1034_v0  ;;  %v1376_v14 = vpop.f32.mrb[11].mxu1 }
 0x5b7   : > { %1049 = vrot.lane.b32.xlu0 %v1039_v13, %s1763_s13 }
 0x621   : > { %v1042_v17 = vpop.permute.xlu0 %1041 }
 0x622   : > { %v1052_v20 = vsel %vm383_vm2, %v544_v18, %v1042_v17 }
 0x625   : > { %v1046_v19 = vpop.permute.xlu1 %1045 }
 0x626   : > { %v1054_v21 = vsel %vm1053_vm3, %v1052_v20, %v1046_v19 }
 0x629   : > { %v1050_v22 = vpop.permute.xlu0 %1049 }
 0x62a   : > { %v1056_v23 = vsel %vm1055_vm4, %v1054_v21, %v1050_v22 }
 0x62b   : > { %1386 = vmatmul.mubr.msk.f32.vlgmr.msra.gmra.mrb[6].mxu0 %vm306_vm1, %v1056_v23 }
 0x6fe   : > { %v1137_v25 = vpop.f32.mrb[6].mxu0 }
 0x6ff   : > { %v1138_v26 = vadd.f32 %v1294_v24, %v1137_v25  ;;  %v1387_v27 = vpop.f32.mrb[7].mxu0 }
 0x701   : > { %1141 = vst.msk [vmem:[%s293_s9] sm:$0xff] %vm306_vm1, %v1138_v26 }
 0x702   : > { %1677 = shalt.err (!%p1674_p0)
}
 0x703   : > { %s1678_s11 = scalar_lea.hbm %s2108_s7, 128  ;;  %s1682_s30 = scalar_lea.hbm %s2158_s5, 256 }
 0x704   : > { %p1679_p2 = scmp.ne.s32.totalorder %s2108_s7, %s1678_s11  ;;  %p1683_p10 = scmp.lt.u32.totalorder %s2108_s7, %s2158_s5 }
 0x705   : > { %p1684_p11 = scmp.lt.u32.totalorder %s1682_s30, %s1678_s11  ;;  %p1686_p6 = scmp.lt.u32.totalorder %s1678_s11, %s2108_s7 }
 0x706   : > { %p1680_p8 = pnand %p1679_p2, %p2176_p5 }
 0x707   : > { %p1685_p1 = por %p1684_p11, %p1683_p10 }
 0x708   : > { %p1681_p4 = pneg %p1680_p8 }
 0x709   : > { %p1687_p7 = por %p1686_p6, %p1685_p1 }
 0x70b   : > { %p1688_p9 = pnand %p1687_p7, %p1681_p4 }
 0x70d   : > { %1691 = shalt.err (!%p1688_p9)
}
 0x70e   : > { %1418 = dma.vmem_to_hbm [thread:$0]  (%p2176_p5), %s2110_s26, 128, %s2108_s7, %s1143_s8  }
 0x70f PF: > { %s1168_s25 = sand.u32 1, %s1726_s18   ;;  %p2177_p12 = scmp.ne.s32.totalorder %s2169_s12, 0 }
 0x710   : > { %p2178_p3 = scmp.ge.s32.totalorder %s1738_s21, 2  ;;  %s1169_s9 = scalar_lea.sflag [#allocation4], %s1168_s25 }
 0x712   : > { %p1438_p13 = pnand %p2178_p3, %p2177_p12 }
 0x714   : > { %1721 = dma.done.wait (!%p1438_p13), %s1169_s9, 128  }
 0x715   : > { %1723 = vsyncadd (!%p1438_p13), %s1169_s9, 4294967168  ;;  %p20_p0 = scmp.ge.s32.totalorder %s1936_s28, 4   ;;  %s2179_s18 = smov %s1730_s19 }
 0x716   : > { %s2180_s19 = smov %s1734_s20  ;;  %s2181_s20 = smov %s1947_s16 }
 0x717   : > { %s2182_s21 = smov %s1936_s28  ;;  %22 = sbr.rel (!%p20_p0) target bundleno = 7 (0x7), region = 101 }
 0x71e   :  { %1174 = vsyncpa [#allocation3], 1 }
 0x71f   :  { %1176 = vsyncpa [#allocation3 + $0x1], 1 }
 0x720   :  { %1177 = vsyncpa [#allocation6], 1 }
 0x721   :  { %1178 = vsyncpa [#allocation9], 1 }
 0x722   :  { %1179 = vsyncpa [#allocation4], 1 }
 0x723   :  { %1181 = vsyncpa [#allocation4 + $0x1], 1 }

// kernel: tpu_custom_call.1
= control target key start
LH: loop header
LB: loop body
LE: loop exit
PB: predicated region body
PF: predicated region fallthrough
CT: control target
= control target key end

     0   :  { %10 = vsyncpa [#allocation3], 0  ;;  %s2366_s0 = inlined_call_operand.hbm [shape: f32[2,8,32], index: 0, kind: input, shape index: {}]   ;;  %s2367_s1 = inlined_call_operand.hbm [shape: f32[32,96], index: 1, kind: input, shape index: {}]   ;;  %s2368_s2 = inlined_call_operand.hbm [shape: f32[1,96], index: 2, kind: input, shape index: {}]   ;;  %s2369_s3 = inlined_call_operand.hbm [shape: f32[32,32], index: 3, kind: input, shape index: {}]   ;;  %s2370_s4 = inlined_call_operand.hbm [shape: f32[1,32], index: 4, kind: input, shape index: {}]   ;;  %s2371_s5 = inlined_call_operand.hbm [shape: f32[2,8,32], index: 5, kind: output, shape index: {}]  }
   0x1   :  { %12 = vsyncpa [#allocation3 + $0x1], 0 }
   0x2   :  { %13 = vsyncpa [#allocation6], 0 }
   0x3   :  { %14 = vsyncpa [#allocation9], 0 }
   0x4   :  { %15 = vsyncpa [#allocation4], 0 }
   0x5   :  { %17 = vsyncpa [#allocation4 + $0x1], 0  ;;  %s2003_s18 = smov 0   ;;  %s2005_s19 = smov 0  }
   0x6   :  { %s2007_s20 = smov 0   ;;  %s2009_s21 = smov 0  }
   0x7 LB: > { %s1951_s22 = smov [#allocation5]   ;;  %s2024_s24 = sadd.s32 4294967295, %s1949_s21   ;;  %s1949_s21 = sphi %s2009_s21, %s2395_s21   ;;  %s1945_s20 = sphi %s2007_s20, %s2394_s20   ;;  %s1941_s19 = sphi %s2005_s19, %s2393_s19   ;;  %s1937_s18 = sphi %s2003_s18, %s2392_s18  }
   0x8   : > { %s176_s23 = sshll.u32 %s1951_s22, 4  ;;  %p1470_p0 = scmp.ge.s32.totalorder %s1949_s21, 1  ;;  %s2029_s23 = int_to_ptr.vmem [resolvable:$true] %s176_s23 }
   0x9   : > { %p2372_p1 = scmp.eq.s32.totalorder %s2024_s24, 0  ;;  %p164_p2 = scmp.lt.s32.totalorder %s1949_s21, 3 }
   0xa   : > { %s1952_s26 = smov [#allocation8]   ;;  %s1953_s29 = smov [#allocation7]  }
   0xb   : > { %p2031_p3 = pnand %p1470_p0, %p164_p2  ;;  %s200_s27 = sshll.u32 %s1952_s26, 4  ;;  %s2044_s27 = int_to_ptr.vmem [resolvable:$true] %s200_s27 }
   0xc   : > { %s190_s30 = sshll.u32 %s1953_s29, 4  ;;  %s1733_s8 = scalar_lea.hbm %s2367_s1, 512  ;;  %s2046_s30 = int_to_ptr.vmem [resolvable:$true] %s190_s30 }
   0xd   : > { %s2375_s25 = scalar_select %p2031_p3, 1, 0 }
   0xe   : > { %p1634_p5 = pneg %p2031_p3  ;;  %p1734_p7 = scmp.ne.s32.totalorder %s2367_s1, %s1733_s8 }
   0xf   : > { %p1740_p11 = scmp.lt.u32.totalorder %s1733_s8, %s2367_s1 }
  0x10   : > { %p2040_p6 = pnand %p1634_p5, %p2372_p1 }
  0x12   : > { %p2056_p8 = pneg %p2040_p6 }
  0x14   : > { %p1736_p9 = pnand %p2056_p8, %p1734_p7 }
  0x16   : > { %p1737_p10 = pneg %p1736_p9 }
  0x18   : > { %p1742_p12 = pnand %p1740_p11, %p1737_p10 }
  0x1a   : > { %1745 = shalt.err (!%p1742_p12)
}
  0x1b   : > { %s1746_s14 = scalar_lea.vmem %s2029_s23, 512  ;;  %p1754_p5 = scmp.lt.s32.totalorder %s2029_s23, %s2029_s23 }
  0x1c   : > { %p1747_p13 = scmp.ne.s32.totalorder %s2029_s23, %s1746_s14  ;;  %p1755_p4 = scmp.lt.s32.totalorder %s1746_s14, %s1746_s14 }
  0x1e   : > { %p1749_p0 = pnand %p1747_p13, %p2056_p8  ;;  %p1756_p7 = por %p1755_p4, %p1754_p5 }
  0x20   : > { %p1750_p2 = pneg %p1749_p0 }
  0x22   : > { %p1757_p9 = pnand %p1756_p7, %p1750_p2 }
  0x24   : > { %1760 = shalt.err (!%p1757_p9)
}
  0x25   : > { %s1954_s15 = smov 128   ;;  %s1955_s16 = smov 8  }
  0x26   : > { %1637 = dma.hbm_to_vmem [thread:$0]  (!%p2040_p6), %s2367_s1, 512, %s2029_s23, [#allocation6], %s1954_s15, %s1954_s15, %s1955_s16  }
  0x27   : > { %s1761_s6 = scalar_lea.hbm %s2369_s3, 512 }
  0x28   : > { %p1762_p4 = scmp.ne.s32.totalorder %s2369_s3, %s1761_s6  ;;  %p1768_p12 = scmp.lt.u32.totalorder %s1761_s6, %s2369_s3 }
  0x2a   : > { %p1764_p10 = pnand %p1762_p4, %p2056_p8 }
  0x2c   : > { %p1765_p11 = pneg %p1764_p10 }
  0x2e   : > { %p1770_p13 = pnand %p1768_p12, %p1765_p11 }
  0x30   : > { %1773 = shalt.err (!%p1770_p13)
}
  0x31   : > { %s1774_s23 = scalar_lea.vmem %s2044_s27, 512  ;;  %p1782_p7 = scmp.lt.s32.totalorder %s2044_s27, %s2044_s27 }
  0x32   : > { %p1775_p0 = scmp.ne.s32.totalorder %s2044_s27, %s1774_s23  ;;  %p1783_p9 = scmp.lt.s32.totalorder %s1774_s23, %s1774_s23 }
  0x34   : > { %p1777_p2 = pnand %p1775_p0, %p2056_p8  ;;  %p1784_p4 = por %p1783_p9, %p1782_p7 }
  0x36   : > { %p1778_p5 = pneg %p1777_p2 }
  0x38   : > { %p1785_p10 = pnand %p1784_p4, %p1778_p5 }
  0x3a   : > { %1788 = shalt.err (!%p1785_p10)
}
  0x3b   : > { %1643 = dma.hbm_to_vmem [thread:$0]  (!%p2040_p6), %s2369_s3, 512, %s2044_s27, [#allocation9], %s1954_s15, %s1954_s15, %s1955_s16  }
  0x3c   : > { %s1789_s22 = scalar_lea.hbm %s2368_s2, 16 }
  0x3d   : > { %p1790_p11 = scmp.ne.s32.totalorder %s2368_s2, %s1789_s22  ;;  %p1796_p0 = scmp.lt.u32.totalorder %s1789_s22, %s2368_s2 }
  0x3f   : > { %p1792_p12 = pnand %p1790_p11, %p2056_p8 }
  0x41   : > { %p1793_p13 = pneg %p1792_p12 }
  0x43   : > { %p1798_p2 = pnand %p1796_p0, %p1793_p13 }
  0x45   : > { %1801 = shalt.err (!%p1798_p2)
}
  0x46   : > { %s1802_s27 = scalar_lea.vmem %s2046_s30, 16  ;;  %s1809_s15 = scalar_lea.vmem %s2046_s30, 32 }
  0x47   : > { %p1803_p5 = scmp.ne.s32.totalorder %s2046_s30, %s1802_s27  ;;  %p1810_p4 = scmp.lt.s32.totalorder %s2046_s30, %s2046_s30 }
  0x48   : > { %p1811_p10 = scmp.lt.s32.totalorder %s1809_s15, %s1802_s27 }
  0x49   : > { %p1805_p7 = pnand %p1803_p5, %p2056_p8 }
  0x4a   : > { %p1812_p11 = por %p1811_p10, %p1810_p4 }
  0x4b   : > { %p1806_p9 = pneg %p1805_p7 }
  0x4d   : > { %p1813_p12 = pnand %p1812_p11, %p1806_p9 }
  0x4f   : > { %1816 = shalt.err (!%p1813_p12)
}
  0x50   : > { %1640 = dma.hbm_to_vmem [thread:$0]  (!%p2040_p6), %s2368_s2, 16, %s2046_s30, [#allocation6]  }
  0x51   : > { %s1956_s9 = smov [#allocation10]   ;;  %s1817_s13 = scalar_lea.hbm %s2370_s4, 16 }
  0x52   : > { %s214_s10 = sshll.u32 %s1956_s9, 4  ;;  %p1818_p13 = scmp.ne.s32.totalorder %s2370_s4, %s1817_s13  ;;  %s215_s10 = int_to_ptr.vmem [resolvable:$true] %s214_s10 }
  0x53   : > { %p1824_p5 = scmp.lt.u32.totalorder %s1817_s13, %s2370_s4 }
  0x54   : > { %p1820_p0 = pnand %p1818_p13, %p2056_p8 }
  0x56   : > { %p1821_p2 = pneg %p1820_p0 }
  0x58   : > { %p1826_p7 = pnand %p1824_p5, %p1821_p2 }
  0x5a   : > { %1829 = shalt.err (!%p1826_p7)
}
  0x5b   : > { %s1830_s30 = scalar_lea.vmem %s215_s10, 16  ;;  %s1837_s29 = scalar_lea.vmem %s215_s10, 32 }
  0x5c   : > { %p1831_p9 = scmp.ne.s32.totalorder %s215_s10, %s1830_s30  ;;  %p1838_p11 = scmp.lt.s32.totalorder %s215_s10, %s215_s10 }
  0x5d   : > { %p1839_p12 = scmp.lt.s32.totalorder %s1837_s29, %s1830_s30 }
  0x5e   : > { %p1833_p4 = pnand %p1831_p9, %p2056_p8 }
  0x5f   : > { %p1840_p1 = por %p1839_p12, %p1838_p11 }
  0x60   : > { %p1834_p10 = pneg %p1833_p4 }
  0x62   : > { %p1841_p3 = pnand %p1840_p1, %p1834_p10 }
  0x64   : > { %1844 = shalt.err (!%p1841_p3)
}
  0x65   : > { %1646 = dma.hbm_to_vmem [thread:$0]  (!%p2040_p6), %s2370_s4, 16, %s215_s10, [#allocation9]  }
  0x66   : > { %s1469_s11 = sadd.s32 4294967294, %s1949_s21   ;;  %s2144_s28 = sadd.s32 1, %s1949_s21  }
  0x67   : > { %s27_s27 = ssub.s32 %s1949_s21, %s2144_s28  ;;  %s30_s15 = sadd.s32 1, %s1945_s20 }
  0x68   : > { %p28_p1 = scmp.eq.s32.totalorder %s27_s27, 0  ;;  %p37_p3 = scmp.ne.s32.totalorder %s1945_s20, %s1941_s19 }
  0x69   : > { %p38_p8 = scmp.eq.s32.totalorder %s1949_s21, 0  ;;  %p43_p13 = scmp.ne.s32.totalorder %s1941_s19, %s1937_s18 }
  0x6a   : > { %s2155_s16 = scalar_select %p28_p1, %s1945_s20, %s30_s15  }
  0x6b   : > { %p2157_p0 = por %p38_p8, %p37_p3  ;;  %p2379_p2 = scmp.eq.s32.totalorder %s2024_s24, 0 }
  0x6c   : > { %p151_p5 = scmp.eq.s32.totalorder %s2024_s24, 1  ;;  %p157_p7 = scmp.eq.s32.totalorder %s1469_s11, 1 }
  0x6d   : > { %p2163_p6 = por %p2379_p2, %p43_p13  ;;  %p1659_p9 = scmp.lt.s32.totalorder %s1949_s21, 2 }
  0x6e   : > { %s225_s10 = sand.u32 1, %s1945_s20   ;;  %p2170_p4 = por %p151_p5, %p37_p3 }
  0x6f   : > { %p2174_p10 = por %p157_p7, %p43_p13  ;;  %s1476_s13 = sshll.u32 %s225_s10, 3 }
  0x70   : > { %s2381_s23 = scalar_select %p2170_p4, 1, 0 }
  0x71   : > { %s2382_s12 = scalar_select %p2174_p10, 1, 0 }
  0x72   : > { %s1477_s14 = sshll.u32 %s1949_s21, 7  ;;  %s229_s30 = scalar_lea.vmem [#allocation2], %s1476_s13 }
  0x73   : > { %s2182_s26 = scalar_lea.hbm %s2366_s0, %s1477_s14  ;;  %s236_s29 = sshll.u32 %s229_s30, 4  ;;  %s2184_s29 = int_to_ptr.vmem [resolvable:$true] %s236_s29 }
  0x74   : > { %p2188_p11 = pnand %p1659_p9, %p2157_p0  ;;  %s226_s7 = scalar_lea.sflag [#allocation3], %s225_s10 }
  0x75   : > { %s1845_s11 = scalar_lea.hbm %s2182_s26, 128  ;;  %s1850_s13 = scalar_lea.hbm %s2366_s0, 256 }
  0x76   : > { %p1846_p12 = scmp.ne.s32.totalorder %s2182_s26, %s1845_s11  ;;  %p1847_p1 = pneg %p2188_p11 }
  0x77   : > { %p1851_p13 = scmp.lt.u32.totalorder %s2182_s26, %s2366_s0  ;;  %p1852_p0 = scmp.lt.u32.totalorder %s1850_s13, %s1845_s11 }
  0x78   : > { %p1848_p3 = pnand %p1847_p1, %p1846_p12  ;;  %p1854_p5 = scmp.lt.u32.totalorder %s1845_s11, %s2182_s26 }
  0x79   : > { %p1853_p2 = por %p1852_p0, %p1851_p13 }
  0x7a   : > { %p1849_p8 = pneg %p1848_p3 }
  0x7b   : > { %p1855_p7 = por %p1854_p5, %p1853_p2 }
  0x7d   : > { %p1856_p9 = pnand %p1855_p7, %p1849_p8 }
  0x7f   : > { %1859 = shalt.err (!%p1856_p9)
}
  0x80   : > { %s1860_s10 = scalar_lea.vmem %s2184_s29, 128  ;;  %s1957_s17 = smov [#allocation2]  }
  0x81   : > { %p1861_p12 = scmp.ne.s32.totalorder %s2184_s29, %s1860_s10  ;;  %s1865_s22 = sshll.u32 %s1957_s17, 4  ;;  %s1866_s22 = int_to_ptr.vmem [resolvable:$false] %s1865_s22 }
  0x82   : > { %s1867_s30 = scalar_lea.vmem %s1866_s22, 256  ;;  %p1868_p4 = scmp.lt.s32.totalorder %s2184_s29, %s1866_s22 }
  0x83   : > { %p1863_p3 = pnand %p1861_p12, %p1847_p1  ;;  %p1869_p13 = scmp.lt.s32.totalorder %s1867_s30, %s1860_s10 }
  0x85   : > { %p1864_p10 = pneg %p1863_p3  ;;  %p1870_p0 = por %p1869_p13, %p1868_p4 }
  0x87   : > { %p1871_p2 = pnand %p1870_p0, %p1864_p10 }
  0x89   : > { %1874 = shalt.err (!%p1871_p2)
}
  0x8a   : > { %1650 = dma.hbm_to_vmem [thread:$0]  (!%p2188_p11), %s2182_s26, 128, %s2184_s29, %s226_s7  }
  0x8b   : > { %p2384_p8 = scmp.ne.s32.totalorder %s2375_s25, 0 }
  0x8c   : > { %s2220_s11 = sand.u32 (!%p2384_p8), 1, %s1941_s19  }
  0x8d   : > { %245 = sbr.rel (%p2384_p8) target bundleno = 2277 (0x8e5), region = 40  ;;  %s1479_s27 = sshll.u32 (!%p2384_p8), %s2220_s11, 3 }
  0x8e   : > { %s248_s15 = scalar_lea.sflag (!%p2384_p8), [#allocation3], %s2220_s11  ;;  %s251_s13 = scalar_lea.vmem (!%p2384_p8), [#allocation2], %s1479_s27 }
  0x94   : > { %1920 = dma.done.wait (%p2163_p6), %s248_s15, 128  }
  0x95   : > { %1922 = vsyncadd (%p2163_p6), %s248_s15, 4294967168  ;;  %p2385_p4 = scmp.eq.s32.totalorder %s2024_s24, 0 }
  0x97   : > { %1924 = dma.done.wait (%p2385_p4), [#allocation6], 528   ;;  %p2386_p10 = pmov %p2385_p4 }
  0x98   : > { %p2387_p11 = pmov %p2385_p4 }
  0x99   : > { %1926 = vsyncadd (%p2386_p10), [#allocation6], 4294966768 }
  0x9a   : > { %1928 = dma.done.wait (%p2387_p11), [#allocation9], 528   ;;  %p2388_p1 = pmov %p2385_p4 }
  0x9b   : > { %v1958_v0 = vmov 0.0|0.0   ;;  %vm1959_vm0 = vmmov 0   ;;  %v1960_v1 = vmov 0.0   ;;  %v295_v2 = vld [vmem:[#allocation5] sm:$0xff]  ;;  %v296_v3 = vld [vmem:[#allocation5 + $0x8] sm:$0xff]  ;;  %v297_v4 = vld [vmem:[#allocation5 + $0x10] sm:$0xff] }
  0x9c   : > { %1930 = vsyncadd (%p2388_p1), [#allocation9], 4294966768  ;;  %1608 = vmatprep.subr.bf16.mxu0 %v1958_v0  ;;  %1545 = vmatprep.mubr.msk.f32.mxu0 %vm1959_vm0, %v1960_v1  ;;  %v1609_v5 = vpack.c.bf16 %v296_v3, %v295_v2  ;;  %v298_v6 = vld [vmem:[#allocation5 + $0x18] sm:$0xff]  ;;  %vm306_vm1 = vcmask 261120   ;;  %v1485_v9 = vld [vmem:[#allocation7] ss:$0 sm:$0xff] }
  0x9d   : > { %1548 = vmatprep.subr.mxu1 %v1960_v1  ;;  %1550 = vmatprep.mubr.msk.f32.mxu1 %vm1959_vm0, %v1960_v1  ;;  %v1612_v7 = vpack.c.bf16 %v298_v6, %v297_v4  ;;  %v294_v8 = vld [vmem:[%s251_s13] sm:$0xff]  ;;  %s1961_s25 = smov 120   ;;  %s1962_s9 = smov 96   ;;  %vm387_vm2 = vcmask 64512   ;;  %v380_v35 = vld [vmem:[#allocation8] sm:$0xff] }
  0x9e   : > { %1610 = vmatpush3.bf16.msra.mxu0 %v1609_v5  ;;  %s1963_s26 = smov 88   ;;  %s1964_s29 = smov 56   ;;  %v381_v34 = vld [vmem:[#allocation8 + $0x8] sm:$0xff] }
  0x9f   : > { %1611 = vmatprep.subr.bf16.mxu0 %v1958_v0  ;;  %s1965_s6 = smov 64   ;;  %s1966_s7 = smov 80   ;;  %v382_v0 = vld [vmem:[#allocation8 + $0x10] sm:$0xff] }
  0xa0   : > { %s1967_s8 = smov 112   ;;  %s1968_s14 = smov 48  }
  0xa1   : > { %s1969_s10 = smov 72   ;;  %s1970_s17 = smov 104  }
  0xa2   : > { %1613 = vmatpush3.bf16.msra.mxu0 %v1612_v7  ;;  %s1971_s22 = smov 40   ;;  %s1505_s30 = sshll.u32 %s2024_s24, 7 }
  0xa3   : > { %1558 = vmatprep.subr.mxu0 %v1960_v1  ;;  %s293_s15 = scalar_lea.vmem [#allocation11], %s1479_s27  ;;  %p2389_p5 = scmp.ne.s32.totalorder %s2381_s23, 0 }
  0xa4   : > { %s1361_s13 = sshll.u32 %s293_s15, 4  ;;  %s1972_s27 = smov [#allocation11]   ;;  %s2323_s13 = int_to_ptr.vmem [resolvable:$true] %s1361_s13 }
  0xa5   : > { %1546 = vmatmul.mubr.msk.f32.vlgmr.msra.gmra.mrb[0].mxu0 %vm306_vm1, %v294_v8  ;;  %s1875_s24 = scalar_lea.vmem %s2323_s13, 128 }
  0xa6   : > { %1560 = vmatprep.mubr.msk.f32.mxu0 %vm1959_vm0, %v1960_v1  ;;  %p1876_p6 = scmp.ne.s32.totalorder %s2323_s13, %s1875_s24 }
  0xa8   : > { %p1877_p7 = pnand %p1876_p6, %p2389_p5 }
  0xaa   : > { %p1878_p9 = pneg %p1877_p7 }
 0x178   : > { %v376_v10 = vpop.f32.mrb[0].mxu0 }
 0x179   : > { %v2247_v11 = vadd.f32 %v1485_v9, %v376_v10  ;;  %v1547_v12 = vpop.f32.mrb[1].mxu0 }
 0x17b   : > { %549 = vrot.lane.b32.xlu1 %v2247_v11, %s1961_s25  ;;  %385 = vrot.lane.b32.xlu0 %v2247_v11, %s1962_s9 }
 0x17f   : > { %551 = vrot.lane.b32.xlu0 %v2247_v11, %s1963_s26  ;;  %s2321_s26 = scalar_lea.hbm %s2371_s5, %s1505_s30 }
 0x1ed   : > { %v386_v13 = vpop.permute.xlu0 %385  ;;  %v550_v15 = vpop.permute.xlu1 %549 }
 0x1ee   : > { %1549 = vmatpush3.xpose.msk.msra.mxu1 %vm387_vm2, %v386_v13 }
 0x1ef   : > { %1553 = vmatprep.subr.mxu1 %v1960_v1 }
 0x1f1   : > { %1551 = vmatmul.mubr.msk.f32.vlgmr.msra.gmra.mrb[0].mxu1 %vm387_vm2, %v2247_v11  ;;  %v552_v14 = vpop.permute.xlu0 %551 }
 0x1f2   : > { %1559 = vmatpush3.xpose.msk.msra.mxu0 %vm387_vm2, %v552_v14  ;;  %1555 = vmatprep.mubr.msk.f32.mxu1 %vm1959_vm0, %v1960_v1 }
 0x1f3   : > { %1568 = vmatprep.subr.mxu0 %v1960_v1 }
 0x1f5   : > { %1561 = vmatmul.mubr.msk.f32.vlgmr.msra.gmra.mrb[2].mxu0 %vm387_vm2, %v550_v15 }
 0x1f6   : > { %1570 = vmatprep.mubr.msk.f32.mxu0 %vm1959_vm0, %v1960_v1  ;;  %1569 = vmatpush3.msra.mxu0 %v381_v34 }
 0x1f7   : > { %1578 = vmatprep.subr.mxu0 %v1960_v1 }
 0x2c4   : > { %v458_v16 = vpop.f32.mrb[0].mxu1 }
 0x2c5   : > { %v1552_v17 = vpop.f32.mrb[1].mxu1  ;;  %v462_v18 = vsel %vm387_vm2, %v458_v16, -inf }
 0x2c6   : > { %463 = vmax.xlane.f32.xlu1 %v462_v18 }
 0x2c8   : > { %v623_v19 = vpop.f32.mrb[2].mxu0 }
 0x2c9   : > { %v1562_v20 = vpop.f32.mrb[3].mxu0  ;;  %v627_v21 = vsel %vm387_vm2, %v623_v19, -inf }
 0x2ca   : > { %628 = vmax.xlane.f32.xlu0 %v627_v21 }
 0x2d7   : > { %636 = vrot.lane.b32.xlu1 %v2247_v11, %s1964_s29  ;;  %s1348_s29 = scalar_lea.sflag [#allocation4], %s2220_s11 }
 0x2e0   : > { %471 = vrot.lane.b32.xlu0 %v2247_v11, %s1965_s6  ;;  %s1879_s6 = sshll.u32 %s1972_s27, 4  ;;  %s1880_s6 = int_to_ptr.vmem [resolvable:$false] %s1879_s6 }
 0x2e1   : > { %p1882_p12 = scmp.lt.s32.totalorder %s2323_s13, %s1880_s6 }
 0x2e4   : > { %862 = vrot.lane.b32.xlu0 %v2247_v11, %s1966_s7  ;;  %s1881_s7 = scalar_lea.vmem %s1880_s6, 256 }
 0x2e5   : > { %p1883_p3 = scmp.lt.s32.totalorder %s1881_s7, %s1875_s24 }
 0x2e7   : > { %p1884_p13 = por %p1883_p3, %p1882_p12 }
 0x2e8   : > { %860 = vrot.lane.b32.xlu0 %v2247_v11, %s1967_s8 }
 0x2e9   : > { %p1885_p0 = pnand %p1884_p13, %p1878_p9 }
 0x353   : > { %v464_v22 = vpop.xlane.xlu1 %463 }
 0x354   : > { %v465_v23 = vsub.f32 %v458_v16, %v464_v22 }
 0x356   : > { %v466_v24 = vmul.f32 1.442695, %v465_v23 }
 0x357   : > { %v629_v25 = vpop.xlane.xlu0 %628  ;;  %v637_v30 = vpop.permute.xlu1 %636 }
 0x358   : > { %1717 = vpow2.f32 %v466_v24  ;;  %v630_v26 = vsub.f32 %v623_v19, %v629_v25  ;;  %v383_v19 = vld [vmem:[#allocation8 + $0x18] sm:$0xff]  ;;  %v1503_v25 = vld [vmem:[#allocation10] ss:$0 sm:$0xff] }
 0x35a   : > { %v631_v27 = vmul.f32 1.442695, %v630_v26 }
 0x35b   : > { %v472_v28 = vpop.permute.xlu0 %471 }
 0x35c   : > { %1719 = vpow2.f32 %v631_v27  ;;  %1554 = vmatpush3.msra.mxu1 %v472_v28 }
 0x35d   : > { %1563 = vmatprep.subr.mxu1 %v1960_v1 }
 0x35f   : > { %v863_v36 = vpop.permute.xlu0 %862 }
 0x362   : > { %v1718_v29 = vpop.eup %1717 }
 0x363   : > { %1556 = vmatmul.mubr.msk.f32.vlgmr.msra.gmra.mrb[2].mxu1 %vm387_vm2, %v1718_v29  ;;  %v468_v31 = vsel %vm387_vm2, %v1718_v29, 0.0  ;;  %v861_v37 = vpop.permute.xlu0 %860 }
 0x364   : > { %1564 = vmatpush3.msra.mxu1 %v637_v30  ;;  %469 = vadd.xlane.f32.xlu0 %v468_v31 }
 0x365   : > { %1565 = vmatprep.mubr.msk.f32.mxu1 %vm1959_vm0, %v1960_v1  ;;  %1573 = vmatprep.subr.mxu1 %v1960_v1 }
 0x366   : > { %v1720_v32 = vpop.eup %1719 }
 0x367   : > { %1566 = vmatmul.mubr.msk.f32.vlgmr.msra.gmra.mrb[4].mxu1 %vm387_vm2, %v1720_v32  ;;  %v633_v33 = vsel %vm387_vm2, %v1720_v32, 0.0 }
 0x368   : > { %634 = vadd.xlane.f32.xlu1 %v633_v33  ;;  %1575 = vmatprep.mubr.msk.f32.mxu1 %vm1959_vm0, %v1960_v1 }
 0x369   : > { %1574 = vmatpush3.msra.mxu1 %v380_v35 }
 0x36a   : > { %1583 = vmatprep.subr.mxu1 %v1960_v1 }
 0x379   : > { %947 = vrot.lane.b32.xlu1 %v2247_v11, %s1968_s14 }
 0x37a   : > { %1101 = vrot.lane.b32.xlu0 %v2247_v11, %s1969_s10 }
 0x3f1   : > { %v470_v38 = vpop.xlane.xlu0 %469 }
 0x3f2   : > { %1721 = vrcp.f32 %v470_v38 }
 0x3f5   : > { %v635_v39 = vpop.xlane.xlu1 %634  ;;  %v1102_v61 = vpop.permute.xlu0 %1101 }
 0x3f6   : > { %1723 = vrcp.f32 %v635_v39 }
 0x3f9   : > { %v948_v44 = vpop.permute.xlu1 %947 }
 0x3fc   : > { %v1722_v40 = vpop.eup %1721 }
 0x400   : > { %v1724_v45 = vpop.eup %1723 }
 0x436   : > { %v543_v41 = vpop.f32.mrb[2].mxu1 }
 0x437   : > { %v548_v42 = vmul.f32 %v1722_v40, %v543_v41  ;;  %v1557_v43 = vpop.f32.mrb[3].mxu1 }
 0x439   : > { %1576 = vmatmul.mubr.msk.f32.vlgmr.msra.gmra.mrb[6].mxu1 %vm387_vm2, %v548_v42 }
 0x43a   : > { %1584 = vmatpush3.msra.mxu1 %v948_v44  ;;  %v708_v46 = vpop.f32.mrb[4].mxu1  ;;  %1585 = vmatprep.mubr.msk.f32.mxu1 %vm1959_vm0, %v1960_v1 }
 0x43b   : > { %v713_v47 = vmul.f32 %v1724_v45, %v708_v46  ;;  %v1567_v48 = vpop.f32.mrb[5].mxu1  ;;  %1593 = vmatprep.subr.mxu1 %v1960_v1 }
 0x43d   : > { %1571 = vmatmul.mubr.msk.f32.vlgmr.msra.gmra.mrb[4].mxu0 %vm387_vm2, %v713_v47 }
 0x43e   : > { %1579 = vmatpush3.xpose.msk.msra.mxu0 %vm387_vm2, %v863_v36  ;;  %1580 = vmatprep.mubr.msk.f32.mxu0 %vm1959_vm0, %v1960_v1 }
 0x43f   : > { %1588 = vmatprep.subr.mxu0 %v1960_v1 }
 0x441   : > { %1581 = vmatmul.mubr.msk.f32.vlgmr.msra.gmra.mrb[6].mxu0 %vm387_vm2, %v861_v37 }
 0x442   : > { %1590 = vmatprep.mubr.msk.f32.mxu0 %vm1959_vm0, %v1960_v1  ;;  %1589 = vmatpush3.msra.mxu0 %v382_v0 }
 0x443   : > { %1598 = vmatprep.subr.mxu0 %v1960_v1 }
 0x50c   : > { %v856_v49 = vpop.f32.mrb[6].mxu1 }
 0x50d   : > { %v1577_v50 = vpop.f32.mrb[7].mxu1 }
 0x510   : > { %v783_v51 = vpop.f32.mrb[4].mxu0 }
 0x511   : > { %v857_v52 = vadd.f32 %v856_v49, %v783_v51  ;;  %v1572_v53 = vpop.f32.mrb[5].mxu0 }
 0x514   : > { %v934_v54 = vpop.f32.mrb[6].mxu0 }
 0x515   : > { %v1582_v55 = vpop.f32.mrb[7].mxu0  ;;  %v938_v56 = vsel %vm387_vm2, %v934_v54, -inf }
 0x516   : > { %939 = vmax.xlane.f32.xlu1 %v938_v56 }
 0x527   : > { %1099 = vrot.lane.b32.xlu1 %v2247_v11, %s1970_s17 }
 0x5a3   : > { %v940_v57 = vpop.xlane.xlu1 %939 }
 0x5a4   : > { %v941_v58 = vsub.f32 %v934_v54, %v940_v57 }
 0x5a6   : > { %v942_v59 = vmul.f32 1.442695, %v941_v58 }
 0x5a7   : > { %v1100_v63 = vpop.permute.xlu1 %1099 }
 0x5a8   : > { %1725 = vpow2.f32 %v942_v59 }
 0x5b2   : > { %v1726_v60 = vpop.eup %1725 }
 0x5b3   : > { %1586 = vmatmul.mubr.msk.f32.vlgmr.msra.gmra.mrb[8].mxu1 %vm387_vm2, %v1726_v60  ;;  %v944_v62 = vsel %vm387_vm2, %v1726_v60, 0.0 }
 0x5b4   : > { %1594 = vmatpush3.xpose.msk.msra.mxu1 %vm387_vm2, %v1102_v61  ;;  %945 = vadd.xlane.f32.xlu1 %v944_v62 }
 0x5b5   : > { %1595 = vmatprep.mubr.msk.f32.mxu1 %vm1959_vm0, %v1960_v1  ;;  %1603 = vmatprep.subr.mxu1 %v1960_v1 }
 0x5b7   : > { %1596 = vmatmul.mubr.msk.f32.vlgmr.msra.gmra.mrb[10].mxu1 %vm387_vm2, %v1100_v63 }
 0x5b8   : > { %1605 = vmatprep.mubr.msk.f32.mxu1 %vm1959_vm0, %v1960_v1  ;;  %1604 = vmatpush3.msra.mxu1 %v383_v19 }
 0x641   : > { %v946_v2 = vpop.xlane.xlu1 %945 }
 0x642   : > { %1727 = vrcp.f32 %v946_v2 }
 0x64c   : > { %v1728_v3 = vpop.eup %1727 }
 0x686   : > { %v1019_v4 = vpop.f32.mrb[8].mxu1 }
 0x687   : > { %v1024_v5 = vmul.f32 %v1728_v3, %v1019_v4  ;;  %v1587_v6 = vpop.f32.mrb[9].mxu1 }
 0x689   : > { %1591 = vmatmul.mubr.msk.f32.vlgmr.msra.gmra.mrb[8].mxu0 %vm387_vm2, %v1024_v5 }
 0x68a   : > { %v1173_v7 = vpop.f32.mrb[10].mxu1  ;;  %1600 = vmatprep.mubr.msk.f32.mxu0 %vm1959_vm0, %v1960_v1 }
 0x68b   : > { %v1597_v8 = vpop.f32.mrb[11].mxu1  ;;  %v1177_v9 = vsel %vm387_vm2, %v1173_v7, -inf }
 0x68c   : > { %1178 = vmax.xlane.f32.xlu0 %v1177_v9 }
 0x6a2   : > { %1186 = vrot.lane.b32.xlu0 %v2247_v11, %s1971_s22 }
 0x719   : > { %v1179_v10 = vpop.xlane.xlu0 %1178 }
 0x71a   : > { %v1180_v12 = vsub.f32 %v1173_v7, %v1179_v10 }
 0x71c   : > { %v1181_v13 = vmul.f32 1.442695, %v1180_v12 }
 0x71d   : > { %v1187_v14 = vpop.permute.xlu0 %1186 }
 0x71e   : > { %1729 = vpow2.f32 %v1181_v13  ;;  %1599 = vmatpush3.msra.mxu0 %v1187_v14 }
 0x728   : > { %v1730_v15 = vpop.eup %1729 }
 0x729   : > { %1601 = vmatmul.mubr.msk.f32.vlgmr.msra.gmra.mrb[10].mxu0 %vm387_vm2, %v1730_v15  ;;  %v1183_v16 = vsel %vm387_vm2, %v1730_v15, 0.0 }
 0x72a   : > { %1184 = vadd.xlane.f32.xlu1 %v1183_v16 }
 0x75c   : > { %v1094_v1 = vpop.f32.mrb[8].mxu0 }
 0x75d   : > { %v1098_v17 = vadd.f32 %v1094_v1, %v857_v52  ;;  %v1592_v18 = vpop.f32.mrb[9].mxu0 }
 0x7b7   : > { %v1185_v11 = vpop.xlane.xlu1 %1184 }
 0x7b8   : > { %1731 = vrcp.f32 %v1185_v11 }
 0x7c2   : > { %v1732_v20 = vpop.eup %1731 }
 0x7fc   : > { %v1258_v21 = vpop.f32.mrb[10].mxu0 }
 0x7fd   : > { %v1263_v22 = vmul.f32 %v1732_v20, %v1258_v21  ;;  %v1602_v23 = vpop.f32.mrb[11].mxu0 }
 0x7ff   : > { %1606 = vmatmul.mubr.msk.f32.vlgmr.msra.gmra.mrb[12].mxu1 %vm387_vm2, %v1263_v22 }
 0x8d2   : > { %v1333_v24 = vpop.f32.mrb[12].mxu1 }
 0x8d3   : > { %v1337_v26 = vadd.f32 %v1333_v24, %v1098_v17  ;;  %v1607_v27 = vpop.f32.mrb[13].mxu1 }
 0x8d5   : > { %v1345_v28 = vadd.f32 %v1503_v25, %v1337_v26 }
 0x8d7   : > { %1346 = vst.msk [vmem:[%s293_s15] sm:$0xff] %vm306_vm1, %v1345_v28 }
 0x8d8   : > { %1888 = shalt.err (!%p1885_p0)
}
 0x8d9   : > { %s1889_s11 = scalar_lea.hbm %s2321_s26, 128  ;;  %s1893_s10 = scalar_lea.hbm %s2371_s5, 256 }
 0x8da   : > { %p1890_p2 = scmp.ne.s32.totalorder %s2321_s26, %s1889_s11  ;;  %p1894_p10 = scmp.lt.u32.totalorder %s2321_s26, %s2371_s5 }
 0x8db   : > { %p1895_p11 = scmp.lt.u32.totalorder %s1893_s10, %s1889_s11  ;;  %p1897_p6 = scmp.lt.u32.totalorder %s1889_s11, %s2321_s26 }
 0x8dc   : > { %p1891_p8 = pnand %p1890_p2, %p2389_p5 }
 0x8dd   : > { %p1896_p1 = por %p1895_p11, %p1894_p10 }
 0x8de   : > { %p1892_p4 = pneg %p1891_p8 }
 0x8df   : > { %p1898_p7 = por %p1897_p6, %p1896_p1 }
 0x8e1   : > { %p1899_p9 = pnand %p1898_p7, %p1892_p4 }
 0x8e3   : > { %1902 = shalt.err (!%p1899_p9)
}
 0x8e4   : > { %1632 = dma.vmem_to_hbm [thread:$0]  (%p2389_p5), %s2323_s13, 128, %s2321_s26, %s1348_s29  }
 0x8e5 PF: > { %s1373_s30 = sand.u32 1, %s1937_s18   ;;  %p2390_p12 = scmp.ne.s32.totalorder %s2382_s12, 0 }
 0x8e6   : > { %p2391_p3 = scmp.ge.s32.totalorder %s1949_s21, 2  ;;  %s1374_s15 = scalar_lea.sflag [#allocation4], %s1373_s30 }
 0x8e8   : > { %p1652_p13 = pnand %p2391_p3, %p2390_p12 }
 0x8ea   : > { %1932 = dma.done.wait (!%p1652_p13), %s1374_s15, 128  }
 0x8eb   : > { %1934 = vsyncadd (!%p1652_p13), %s1374_s15, 4294967168  ;;  %p20_p0 = scmp.ge.s32.totalorder %s2144_s28, 4   ;;  %s2392_s18 = smov %s1941_s19 }
 0x8ec   : > { %s2393_s19 = smov %s1945_s20  ;;  %s2394_s20 = smov %s2155_s16 }
 0x8ed   : > { %s2395_s21 = smov %s2144_s28  ;;  %22 = sbr.rel (!%p20_p0) target bundleno = 7 (0x7), region = 101 }
 0x8f4   :  { %1379 = vsyncpa [#allocation3], 1 }
 0x8f5   :  { %1381 = vsyncpa [#allocation3 + $0x1], 1 }
 0x8f6   :  { %1382 = vsyncpa [#allocation6], 1 }
 0x8f7   :  { %1383 = vsyncpa [#allocation9], 1 }
 0x8f8   :  { %1384 = vsyncpa [#allocation4], 1 }
 0x8f9   :  { %1386 = vsyncpa [#allocation4 + $0x1], 1 }

</bundles_post_ra>
